<compile_context>
chip_gen: v7x
topology: tpu7x:2x2x1
jax: 0.10.0
libtpu: 0.0.40
codegen_flags: <defaults>
</compile_context>

<pallas_src>
import math
import functools

import jax
import jax.numpy as jnp
from jax.experimental import pallas as pl
from jax.experimental.pallas import tpu as pltpu


_LANE = 128
_SUBLANE = 8
_VMEM_BUDGET = 40 * 1024 * 1024        # working budget for tiles + resident weights
_VMEM_LIMIT_BYTES = 48 * 1024 * 1024   # scoped VMEM limit (safe on v5e/v6e/v7x)
_NEG_2C = -2.0 * math.sqrt(2.0 / math.pi)


def _round_up(n, m):
    return ((n + m - 1) // m) * m


def _cdiv(a, b):
    return -(-a // b)


def _mxu_lane_align():
    # v6e / v7x MXUs are 2x256x256 -> pad wide dims to 256; v2-v5 are 128x128.
    try:
        kind = jax.devices()[0].device_kind.lower()
    except Exception:
        return 256
    return 128 if any(t in kind for t in ("v2", "v3", "v4", "v5")) else 256


def _pad_dim(n, align):
    if n <= _LANE:
        return _LANE
    return _round_up(n, align)


def _gelu_tanh(x):
    # tanh-approx GELU in sigmoid form:
    #   0.5*x*(1+tanh(c*(x+0.044715*x^3)))
    # == x * sigmoid(2c*(x+0.044715*x^3))
    # == x / (1 + exp(-2c * x * (1 + 0.044715*x^2)))
    t = (_NEG_2C * x) * (1.0 + 0.044715 * (x * x))
    return x / (1.0 + jnp.exp(t))


def _fused_mlp_kernel(*refs, residual_flags):
    n = len(residual_flags)
    x_ref = refs[0]
    w_refs = refs[1:1 + n]
    b_refs = refs[1 + n:1 + 2 * n]
    o_ref = refs[1 + 2 * n]

    h = x_ref[...].astype(jnp.float32)                  # (bm, K_0) real width
    for i, add_res in enumerate(residual_flags):
        w = w_refs[i][...]                              # (K_i, Npad_i) bf16/f32
        b = b_refs[i][...].astype(jnp.float32)          # (1, Npad_i)
        z = jnp.dot(h.astype(w.dtype), w,
                    preferred_element_type=jnp.float32) + b
        y = _gelu_tanh(z)
        if add_res:
            if h.shape[-1] != y.shape[-1]:
                # First-layer residual with an unaligned real input width:
                # widen h to the padded layer width with an exact identity
                # matmul (avoids unaligned lane concatenation).
                kdim, wdim = h.shape[-1], y.shape[-1]
                r = jax.lax.broadcasted_iota(jnp.int32, (kdim, wdim), 0)
                c = jax.lax.broadcasted_iota(jnp.int32, (kdim, wdim), 1)
                eye = (r == c).astype(jnp.float32)
                h = jnp.dot(h, eye, preferred_element_type=jnp.float32)
            h = y + h
        else:
            h = y
    o_ref[...] = h.astype(o_ref.dtype)


def fused_mlp_forward(x, weights, biases, residual_flags, *, block_b,
                      vmem_limit_bytes):
    """Fused multi-layer Linear+GELU forward. x: (B, Din) with B % block_b == 0."""
    b_total, din = x.shape
    n_out = weights[-1].shape[-1]
    assert b_total % block_b == 0
    grid = (b_total // block_b,)

    kernel = functools.partial(_fused_mlp_kernel,
                               residual_flags=tuple(residual_flags))
    out_shape = jax.ShapeDtypeStruct((b_total, n_out), x.dtype)
    cparams = pltpu.CompilerParams(
        dimension_semantics=("parallel",),          # batch axis -> both TCs on v7x
        vmem_limit_bytes=vmem_limit_bytes)

    def build(single_buffer_resident):
        def resident_spec(arr):
            # Same block (the whole array) at every grid step -> fetched once,
            # VMEM-resident.  Single-buffer it: double buffering a
            # grid-invariant operand is pure VMEM waste.
            kwargs = {}
            if single_buffer_resident:
                kwargs["pipeline_mode"] = pl.Buffered(1)
            return pl.BlockSpec(arr.shape, lambda i: (0, 0), **kwargs)

        in_specs = [pl.BlockSpec((block_b, din), lambda i: (i, 0))]
        in_specs += [resident_spec(w) for w in weights]
        in_specs += [resident_spec(b) for b in biases]
        return pl.pallas_call(
            kernel,
            out_shape=out_shape,
            grid=grid,
            in_specs=in_specs,
            out_specs=pl.BlockSpec((block_b, n_out), lambda i: (i, 0)),
            compiler_params=cparams,
        )

    try:
        return build(True)(x, *weights, *biases)
    except Exception:
        # TODO(synk): drop this fallback once pl.Buffered(1) support is
        # guaranteed in the deployed jax version.
        return build(False)(x, *weights, *biases)


class ExampleDeepNeuralNetworkPallas:
    """JAX/Pallas port of the PyTorch ExampleDeepNeuralNetwork (fused forward)."""

    def __init__(self, layer_sizes, use_shortcut, key, mxu_dtype=jnp.bfloat16):
        assert len(layer_sizes) == 6
        self.layer_sizes = list(layer_sizes)
        self.use_shortcut = bool(use_shortcut)
        self.mxu_dtype = mxu_dtype
        n_layers = len(layer_sizes) - 1

        keys = jax.random.split(key, n_layers)
        self.params = []  # unpadded f32 (in, out) weights / (1, out) biases
        for i in range(n_layers):
            fan_in, fan_out = layer_sizes[i], layer_sizes[i + 1]
            kw, kb = jax.random.split(keys[i])
            # nn.Linear default init: U(-1/sqrt(fan_in), 1/sqrt(fan_in))
            bound = 1.0 / math.sqrt(fan_in)
            w = jax.random.uniform(kw, (fan_in, fan_out), jnp.float32,
                                   minval=-bound, maxval=bound)
            b = jax.random.uniform(kb, (1, fan_out), jnp.float32,
                                   minval=-bound, maxval=bound)
            self.params.append((w, b))

        # Residual applied iff shapes match at ORIGINAL (unpadded) sizes.
        self.residual_flags = tuple(
            self.use_shortcut and layer_sizes[i] == layer_sizes[i + 1]
            for i in range(n_layers))

        # Per-layer padding: layer i weight is (K_i, Npad_i) with
        # K_0 = real input width, K_i = Npad_{i-1} afterwards.
        align = _mxu_lane_align()
        self.out_pads = [_pad_dim(layer_sizes[i + 1], align)
                         for i in range(n_layers)]
        k_dims = [layer_sizes[0]] + self.out_pads[:-1]
        self.w_padded, self.b_padded = [], []
        for i, (w, b) in enumerate(self.params):
            kp, npad = k_dims[i], self.out_pads[i]
            wp = jnp.zeros((kp, npad), mxu_dtype)
            wp = wp.at[:w.shape[0], :w.shape[1]].set(w.astype(mxu_dtype))
            bp = jnp.zeros((1, npad), jnp.float32).at[:, :b.shape[1]].set(b)
            self.w_padded.append(wp)
            self.b_padded.append(bp)

        self.weight_bytes = sum(int(a.size) * a.dtype.itemsize
                                for a in self.w_padded + self.b_padded)
        self.max_width = max(self.out_pads + [layer_sizes[0]])

    def __call__(self, x):
        batch, din = x.shape
        assert din == self.layer_sizes[0]
        dout = self.layer_sizes[-1]
        dout_pad = self.out_pads[-1]

        # Per-row VMEM bytes: double-buffered input/output tiles (f32) plus
        # working-set headroom for the h/z/y temporaries inside the kernel.
        row_bytes = 8 * din + 8 * dout_pad + 16 * self.max_width
        resident = 2 * self.weight_bytes  # x2 margin if the fallback double-buffers
        avail = max(_VMEM_BUDGET - resident, 64 * row_bytes)
        bm_cap = max(_SUBLANE,
                     min(2048, (avail // row_bytes) // _SUBLANE * _SUBLANE))
        # TODO(synk): if the resident weights alone exceed the VMEM budget
        # (very wide layers), tile the layer axis with an "arbitrary" grid dim
        # instead of keeping all layers resident.

        # Batch padded only to a sublane/tile multiple; >= 2 grid steps when
        # the batch allows so the "parallel" axis shards across v7x's two TCs.
        b_min = _round_up(batch, _SUBLANE)
        if b_min <= _SUBLANE:
            num_tiles = 1              # a second tile would be all padding
        else:
            num_tiles = max(2, _cdiv(b_min, bm_cap))
        bm = _round_up(_cdiv(b_min, num_tiles), _SUBLANE)
        b_total = bm * num_tiles

        x_in = x if b_total == batch else (
            jnp.zeros((b_total, din), x.dtype).at[:batch, :].set(x))

        out_pad = fused_mlp_forward(
            x_in, self.w_padded, self.b_padded, self.residual_flags,
            block_b=bm, vmem_limit_bytes=_VMEM_LIMIT_BYTES)
        # Padded rows/columns carry finite garbage/zeros; slice them off.
        return out_pad[:batch, :dout]


def _reference_forward(x, params, use_shortcut, mxu_dtype=jnp.bfloat16):
    # Pure-JAX reference mirroring the kernel's bf16-MXU / f32-accumulate math.
    h = x.astype(jnp.float32)
    for w, b in params:
        z = jnp.dot(h.astype(mxu_dtype), w.astype(mxu_dtype),
                    preferred_element_type=jnp.float32) + b
        y = _gelu_tanh(z)
        h = (h + y) if (use_shortcut and h.shape == y.shape) else y
    return h


if __name__ == "__main__":
    key = jax.random.PRNGKey(0)
    k1, k2, kx1, kx2 = jax.random.split(key, 4)

    # Config 1: 5 layers with residual shortcuts (exercises the in-kernel
    # identity widening for the first residual).
    layer_sizes = [32, 32, 32, 32, 32, 1]
    model = ExampleDeepNeuralNetworkPallas(layer_sizes, True, k1)
    x = jax.random.normal(kx1, (8, layer_sizes[0]), jnp.float32)
    out = jax.block_until_ready(model(x))
    ref = _reference_forward(x, model.params, True, model.mxu_dtype)
    assert out.shape == (8, 1)
    assert jnp.allclose(out, ref, atol=1e-4, rtol=1e-4), \
        float(jnp.max(jnp.abs(out - ref)))

    # Config 2: heterogeneous widths + batch that is not a tile multiple
    # (exercises per-layer padding, batch padding and the multi-tile grid).
    layer_sizes2 = [48, 64, 64, 32, 32, 1]
    model2 = ExampleDeepNeuralNetworkPallas(layer_sizes2, True, k2)
    x2 = jax.random.normal(kx2, (20, layer_sizes2[0]), jnp.float32)
    out2 = jax.block_until_ready(model2(x2))
    ref2 = _reference_forward(x2, model2.params, True, model2.mxu_dtype)
    assert out2.shape == (20, 1)
    assert jnp.allclose(out2, ref2, atol=1e-4, rtol=1e-4), \
        float(jnp.max(jnp.abs(out2 - ref2)))

    print("KERNEL_OK")
</pallas_src>

<mosaic_0001>
module attributes {stable_mosaic.version = 11 : i64} {
  func.func @_fused_mlp_kernel(%arg0: i32, %arg1: memref<8x32xf32, #tpu.memory_space<vmem>>, %arg2: memref<32x128xbf16, #tpu.memory_space<vmem>>, %arg3: memref<128x128xbf16, #tpu.memory_space<vmem>>, %arg4: memref<128x128xbf16, #tpu.memory_space<vmem>>, %arg5: memref<128x128xbf16, #tpu.memory_space<vmem>>, %arg6: memref<128x128xbf16, #tpu.memory_space<vmem>>, %arg7: memref<1x128xf32, #tpu.memory_space<vmem>>, %arg8: memref<1x128xf32, #tpu.memory_space<vmem>>, %arg9: memref<1x128xf32, #tpu.memory_space<vmem>>, %arg10: memref<1x128xf32, #tpu.memory_space<vmem>>, %arg11: memref<1x128xf32, #tpu.memory_space<vmem>>, %arg12: memref<8x128xf32, #tpu.memory_space<vmem>>) attributes {dimension_semantics = [#tpu.dimension_semantics<parallel>], iteration_bounds = array<i64: 1>, scalar_prefetch = 0 : i64, scratch_operands = 0 : i64, tpu.core_type = #tpu.core_type<tc>, window_params = [{transform_indices = @transform_0, window_bounds = array<i64: 8, 32>}, {pipeline_mode = #tpu.pipeline_mode<synchronous>, transform_indices = @transform_1, window_bounds = array<i64: 32, 128>}, {pipeline_mode = #tpu.pipeline_mode<synchronous>, transform_indices = @transform_2, window_bounds = array<i64: 128, 128>}, {pipeline_mode = #tpu.pipeline_mode<synchronous>, transform_indices = @transform_3, window_bounds = array<i64: 128, 128>}, {pipeline_mode = #tpu.pipeline_mode<synchronous>, transform_indices = @transform_4, window_bounds = array<i64: 128, 128>}, {pipeline_mode = #tpu.pipeline_mode<synchronous>, transform_indices = @transform_5, window_bounds = array<i64: 128, 128>}, {pipeline_mode = #tpu.pipeline_mode<synchronous>, transform_indices = @transform_6, window_bounds = array<i64: 1, 128>}, {pipeline_mode = #tpu.pipeline_mode<synchronous>, transform_indices = @transform_7, window_bounds = array<i64: 1, 128>}, {pipeline_mode = #tpu.pipeline_mode<synchronous>, transform_indices = @transform_8, window_bounds = array<i64: 1, 128>}, {pipeline_mode = #tpu.pipeline_mode<synchronous>, transform_indices = @transform_9, window_bounds = array<i64: 1, 128>}, {pipeline_mode = #tpu.pipeline_mode<synchronous>, transform_indices = @transform_10, window_bounds = array<i64: 1, 128>}, {transform_indices = @transform_11, window_bounds = array<i64: 8, 128>}]} {
    %c0 = arith.constant 0 : index
    %c0_0 = arith.constant 0 : index
    %0 = vector.load %arg1[%c0, %c0_0] : memref<8x32xf32, #tpu.memory_space<vmem>>, vector<8x32xf32>
    %c0_1 = arith.constant 0 : index
    %c0_2 = arith.constant 0 : index
    %1 = vector.load %arg2[%c0_1, %c0_2] : memref<32x128xbf16, #tpu.memory_space<vmem>>, vector<32x128xbf16>
    %c0_3 = arith.constant 0 : index
    %c0_4 = arith.constant 0 : index
    %2 = vector.load %arg7[%c0_3, %c0_4] : memref<1x128xf32, #tpu.memory_space<vmem>>, vector<1x128xf32>
    %3 = arith.truncf %0 : vector<8x32xf32> to vector<8x32xbf16>
    %cst = arith.constant dense<0.000000e+00> : vector<8x128xf32>
    %4 = tpu.matmul %3, %1, %cst {dimension_numbers = #tpu.dot_dimension_numbers<[1], [0], [0], [1], [0, 0, 1, 1], [], []>} : vector<8x32xbf16>, vector<32x128xbf16>, vector<8x128xf32> -> vector<8x128xf32>
    %5 = vector.broadcast %2 : vector<1x128xf32> to vector<8x128xf32>
    %6 = arith.addf %4, %5 : vector<8x128xf32>
    %cst_5 = arith.constant -1.59576917 : f32
    %7 = vector.broadcast %cst_5 : f32 to vector<8x128xf32>
    %8 = arith.mulf %7, %6 : vector<8x128xf32>
    %9 = arith.mulf %6, %6 : vector<8x128xf32>
    %cst_6 = arith.constant 4.471500e-02 : f32
    %10 = vector.broadcast %cst_6 : f32 to vector<8x128xf32>
    %11 = arith.mulf %10, %9 : vector<8x128xf32>
    %cst_7 = arith.constant 1.000000e+00 : f32
    %12 = vector.broadcast %cst_7 : f32 to vector<8x128xf32>
    %13 = arith.addf %12, %11 : vector<8x128xf32>
    %14 = arith.mulf %8, %13 : vector<8x128xf32>
    %15 = math.exp %14 : vector<8x128xf32>
    %cst_8 = arith.constant 1.000000e+00 : f32
    %16 = vector.broadcast %cst_8 : f32 to vector<8x128xf32>
    %17 = arith.addf %16, %15 : vector<8x128xf32>
    %18 = arith.divf %6, %17 : vector<8x128xf32>
    %19 = tpu.iota {dimensions = array<i32: 0>} : vector<32x128xi32>
    %20 = tpu.iota {dimensions = array<i32: 1>} : vector<32x128xi32>
    %21 = arith.cmpi eq, %19, %20 : vector<32x128xi32>
    %22 = arith.extui %21 : vector<32x128xi1> to vector<32x128xi32>
    %23 = arith.sitofp %22 : vector<32x128xi32> to vector<32x128xf32>
    %cst_9 = arith.constant dense<0.000000e+00> : vector<8x128xf32>
    %24 = tpu.matmul %0, %23, %cst_9 {dimension_numbers = #tpu.dot_dimension_numbers<[1], [0], [0], [1], [0, 0, 1, 1], [], []>} : vector<8x32xf32>, vector<32x128xf32>, vector<8x128xf32> -> vector<8x128xf32>
    %25 = arith.addf %18, %24 : vector<8x128xf32>
    %c0_10 = arith.constant 0 : index
    %c0_11 = arith.constant 0 : index
    %26 = vector.load %arg3[%c0_10, %c0_11] : memref<128x128xbf16, #tpu.memory_space<vmem>>, vector<128x128xbf16>
    %c0_12 = arith.constant 0 : index
    %c0_13 = arith.constant 0 : index
    %27 = vector.load %arg8[%c0_12, %c0_13] : memref<1x128xf32, #tpu.memory_space<vmem>>, vector<1x128xf32>
    %28 = arith.truncf %25 : vector<8x128xf32> to vector<8x128xbf16>
    %cst_14 = arith.constant dense<0.000000e+00> : vector<8x128xf32>
    %29 = tpu.matmul %28, %26, %cst_14 {dimension_numbers = #tpu.dot_dimension_numbers<[1], [0], [0], [1], [0, 0, 1, 1], [], []>} : vector<8x128xbf16>, vector<128x128xbf16>, vector<8x128xf32> -> vector<8x128xf32>
    %30 = vector.broadcast %27 : vector<1x128xf32> to vector<8x128xf32>
    %31 = arith.addf %29, %30 : vector<8x128xf32>
    %cst_15 = arith.constant -1.59576917 : f32
    %32 = vector.broadcast %cst_15 : f32 to vector<8x128xf32>
    %33 = arith.mulf %32, %31 : vector<8x128xf32>
    %34 = arith.mulf %31, %31 : vector<8x128xf32>
    %cst_16 = arith.constant 4.471500e-02 : f32
    %35 = vector.broadcast %cst_16 : f32 to vector<8x128xf32>
    %36 = arith.mulf %35, %34 : vector<8x128xf32>
    %cst_17 = arith.constant 1.000000e+00 : f32
    %37 = vector.broadcast %cst_17 : f32 to vector<8x128xf32>
    %38 = arith.addf %37, %36 : vector<8x128xf32>
    %39 = arith.mulf %33, %38 : vector<8x128xf32>
    %40 = math.exp %39 : vector<8x128xf32>
    %cst_18 = arith.constant 1.000000e+00 : f32
    %41 = vector.broadcast %cst_18 : f32 to vector<8x128xf32>
    %42 = arith.addf %41, %40 : vector<8x128xf32>
    %43 = arith.divf %31, %42 : vector<8x128xf32>
    %44 = arith.addf %43, %25 : vector<8x128xf32>
    %c0_19 = arith.constant 0 : index
    %c0_20 = arith.constant 0 : index
    %45 = vector.load %arg4[%c0_19, %c0_20] : memref<128x128xbf16, #tpu.memory_space<vmem>>, vector<128x128xbf16>
    %c0_21 = arith.constant 0 : index
    %c0_22 = arith.constant 0 : index
    %46 = vector.load %arg9[%c0_21, %c0_22] : memref<1x128xf32, #tpu.memory_space<vmem>>, vector<1x128xf32>
    %47 = arith.truncf %44 : vector<8x128xf32> to vector<8x128xbf16>
    %cst_23 = arith.constant dense<0.000000e+00> : vector<8x128xf32>
    %48 = tpu.matmul %47, %45, %cst_23 {dimension_numbers = #tpu.dot_dimension_numbers<[1], [0], [0], [1], [0, 0, 1, 1], [], []>} : vector<8x128xbf16>, vector<128x128xbf16>, vector<8x128xf32> -> vector<8x128xf32>
    %49 = vector.broadcast %46 : vector<1x128xf32> to vector<8x128xf32>
    %50 = arith.addf %48, %49 : vector<8x128xf32>
    %cst_24 = arith.constant -1.59576917 : f32
    %51 = vector.broadcast %cst_24 : f32 to vector<8x128xf32>
    %52 = arith.mulf %51, %50 : vector<8x128xf32>
    %53 = arith.mulf %50, %50 : vector<8x128xf32>
    %cst_25 = arith.constant 4.471500e-02 : f32
    %54 = vector.broadcast %cst_25 : f32 to vector<8x128xf32>
    %55 = arith.mulf %54, %53 : vector<8x128xf32>
    %cst_26 = arith.constant 1.000000e+00 : f32
    %56 = vector.broadcast %cst_26 : f32 to vector<8x128xf32>
    %57 = arith.addf %56, %55 : vector<8x128xf32>
    %58 = arith.mulf %52, %57 : vector<8x128xf32>
    %59 = math.exp %58 : vector<8x128xf32>
    %cst_27 = arith.constant 1.000000e+00 : f32
    %60 = vector.broadcast %cst_27 : f32 to vector<8x128xf32>
    %61 = arith.addf %60, %59 : vector<8x128xf32>
    %62 = arith.divf %50, %61 : vector<8x128xf32>
    %63 = arith.addf %62, %44 : vector<8x128xf32>
    %c0_28 = arith.constant 0 : index
    %c0_29 = arith.constant 0 : index
    %64 = vector.load %arg5[%c0_28, %c0_29] : memref<128x128xbf16, #tpu.memory_space<vmem>>, vector<128x128xbf16>
    %c0_30 = arith.constant 0 : index
    %c0_31 = arith.constant 0 : index
    %65 = vector.load %arg10[%c0_30, %c0_31] : memref<1x128xf32, #tpu.memory_space<vmem>>, vector<1x128xf32>
    %66 = arith.truncf %63 : vector<8x128xf32> to vector<8x128xbf16>
    %cst_32 = arith.constant dense<0.000000e+00> : vector<8x128xf32>
    %67 = tpu.matmul %66, %64, %cst_32 {dimension_numbers = #tpu.dot_dimension_numbers<[1], [0], [0], [1], [0, 0, 1, 1], [], []>} : vector<8x128xbf16>, vector<128x128xbf16>, vector<8x128xf32> -> vector<8x128xf32>
    %68 = vector.broadcast %65 : vector<1x128xf32> to vector<8x128xf32>
    %69 = arith.addf %67, %68 : vector<8x128xf32>
    %cst_33 = arith.constant -1.59576917 : f32
    %70 = vector.broadcast %cst_33 : f32 to vector<8x128xf32>
    %71 = arith.mulf %70, %69 : vector<8x128xf32>
    %72 = arith.mulf %69, %69 : vector<8x128xf32>
    %cst_34 = arith.constant 4.471500e-02 : f32
    %73 = vector.broadcast %cst_34 : f32 to vector<8x128xf32>
    %74 = arith.mulf %73, %72 : vector<8x128xf32>
    %cst_35 = arith.constant 1.000000e+00 : f32
    %75 = vector.broadcast %cst_35 : f32 to vector<8x128xf32>
    %76 = arith.addf %75, %74 : vector<8x128xf32>
    %77 = arith.mulf %71, %76 : vector<8x128xf32>
    %78 = math.exp %77 : vector<8x128xf32>
    %cst_36 = arith.constant 1.000000e+00 : f32
    %79 = vector.broadcast %cst_36 : f32 to vector<8x128xf32>
    %80 = arith.addf %79, %78 : vector<8x128xf32>
    %81 = arith.divf %69, %80 : vector<8x128xf32>
    %82 = arith.addf %81, %63 : vector<8x128xf32>
    %c0_37 = arith.constant 0 : index
    %c0_38 = arith.constant 0 : index
    %83 = vector.load %arg6[%c0_37, %c0_38] : memref<128x128xbf16, #tpu.memory_space<vmem>>, vector<128x128xbf16>
    %c0_39 = arith.constant 0 : index
    %c0_40 = arith.constant 0 : index
    %84 = vector.load %arg11[%c0_39, %c0_40] : memref<1x128xf32, #tpu.memory_space<vmem>>, vector<1x128xf32>
    %85 = arith.truncf %82 : vector<8x128xf32> to vector<8x128xbf16>
    %cst_41 = arith.constant dense<0.000000e+00> : vector<8x128xf32>
    %86 = tpu.matmul %85, %83, %cst_41 {dimension_numbers = #tpu.dot_dimension_numbers<[1], [0], [0], [1], [0, 0, 1, 1], [], []>} : vector<8x128xbf16>, vector<128x128xbf16>, vector<8x128xf32> -> vector<8x128xf32>
    %87 = vector.broadcast %84 : vector<1x128xf32> to vector<8x128xf32>
    %88 = arith.addf %86, %87 : vector<8x128xf32>
    %cst_42 = arith.constant -1.59576917 : f32
    %89 = vector.broadcast %cst_42 : f32 to vector<8x128xf32>
    %90 = arith.mulf %89, %88 : vector<8x128xf32>
    %91 = arith.mulf %88, %88 : vector<8x128xf32>
    %cst_43 = arith.constant 4.471500e-02 : f32
    %92 = vector.broadcast %cst_43 : f32 to vector<8x128xf32>
    %93 = arith.mulf %92, %91 : vector<8x128xf32>
    %cst_44 = arith.constant 1.000000e+00 : f32
    %94 = vector.broadcast %cst_44 : f32 to vector<8x128xf32>
    %95 = arith.addf %94, %93 : vector<8x128xf32>
    %96 = arith.mulf %90, %95 : vector<8x128xf32>
    %97 = math.exp %96 : vector<8x128xf32>
    %cst_45 = arith.constant 1.000000e+00 : f32
    %98 = vector.broadcast %cst_45 : f32 to vector<8x128xf32>
    %99 = arith.addf %98, %97 : vector<8x128xf32>
    %100 = arith.divf %88, %99 : vector<8x128xf32>
    %c0_46 = arith.constant 0 : index
    %c0_47 = arith.constant 0 : index
    %101 = vector.load %arg12[%c0_46, %c0_47] : memref<8x128xf32, #tpu.memory_space<vmem>>, vector<8x128xf32>
    tpu.vector_store %arg12[%c0_46, %c0_47], %100 {strides = array<i32>} : memref<8x128xf32, #tpu.memory_space<vmem>>, vector<8x128xf32>,
    return
  }
  func.func @transform_0(%arg0: i32) -> (i32, i32) {
    %c0_i32 = arith.constant 0 : i32
    %c0_i32_0 = arith.constant 0 : i32
    return %arg0, %c0_i32 : i32, i32
  }
  func.func @transform_1(%arg0: i32) -> (i32, i32) {
    %c0_i32 = arith.constant 0 : i32
    %c0_i32_0 = arith.constant 0 : i32
    %c0_i32_1 = arith.constant 0 : i32
    return %c0_i32, %c0_i32_0 : i32, i32
  }
  func.func @transform_2(%arg0: i32) -> (i32, i32) {
    %c0_i32 = arith.constant 0 : i32
    %c0_i32_0 = arith.constant 0 : i32
    %c0_i32_1 = arith.constant 0 : i32
    return %c0_i32, %c0_i32_0 : i32, i32
  }
  func.func @transform_3(%arg0: i32) -> (i32, i32) {
    %c0_i32 = arith.constant 0 : i32
    %c0_i32_0 = arith.constant 0 : i32
    %c0_i32_1 = arith.constant 0 : i32
    return %c0_i32, %c0_i32_0 : i32, i32
  }
  func.func @transform_4(%arg0: i32) -> (i32, i32) {
    %c0_i32 = arith.constant 0 : i32
    %c0_i32_0 = arith.constant 0 : i32
    %c0_i32_1 = arith.constant 0 : i32
    return %c0_i32, %c0_i32_0 : i32, i32
  }
  func.func @transform_5(%arg0: i32) -> (i32, i32) {
    %c0_i32 = arith.constant 0 : i32
    %c0_i32_0 = arith.constant 0 : i32
    %c0_i32_1 = arith.constant 0 : i32
    return %c0_i32, %c0_i32_0 : i32, i32
  }
  func.func @transform_6(%arg0: i32) -> (i32, i32) {
    %c0_i32 = arith.constant 0 : i32
    %c0_i32_0 = arith.constant 0 : i32
    %c0_i32_1 = arith.constant 0 : i32
    return %c0_i32, %c0_i32_0 : i32, i32
  }
  func.func @transform_7(%arg0: i32) -> (i32, i32) {
    %c0_i32 = arith.constant 0 : i32
    %c0_i32_0 = arith.constant 0 : i32
    %c0_i32_1 = arith.constant 0 : i32
    return %c0_i32, %c0_i32_0 : i32, i32
  }
  func.func @transform_8(%arg0: i32) -> (i32, i32) {
    %c0_i32 = arith.constant 0 : i32
    %c0_i32_0 = arith.constant 0 : i32
    %c0_i32_1 = arith.constant 0 : i32
    return %c0_i32, %c0_i32_0 : i32, i32
  }
  func.func @transform_9(%arg0: i32) -> (i32, i32) {
    %c0_i32 = arith.constant 0 : i32
    %c0_i32_0 = arith.constant 0 : i32
    %c0_i32_1 = arith.constant 0 : i32
    return %c0_i32, %c0_i32_0 : i32, i32
  }
  func.func @transform_10(%arg0: i32) -> (i32, i32) {
    %c0_i32 = arith.constant 0 : i32
    %c0_i32_0 = arith.constant 0 : i32
    %c0_i32_1 = arith.constant 0 : i32
    return %c0_i32, %c0_i32_0 : i32, i32
  }
  func.func @transform_11(%arg0: i32) -> (i32, i32) {
    %c0_i32 = arith.constant 0 : i32
    %c0_i32_0 = arith.constant 0 : i32
    return %arg0, %c0_i32 : i32, i32
  }
}

module attributes {stable_mosaic.version = 11 : i64} {
  func.func @_fused_mlp_kernel(%arg0: i32, %arg1: memref<8x32xf32, #tpu.memory_space<vmem>>, %arg2: memref<32x128xbf16, #tpu.memory_space<vmem>>, %arg3: memref<128x128xbf16, #tpu.memory_space<vmem>>, %arg4: memref<128x128xbf16, #tpu.memory_space<vmem>>, %arg5: memref<128x128xbf16, #tpu.memory_space<vmem>>, %arg6: memref<128x128xbf16, #tpu.memory_space<vmem>>, %arg7: memref<1x128xf32, #tpu.memory_space<vmem>>, %arg8: memref<1x128xf32, #tpu.memory_space<vmem>>, %arg9: memref<1x128xf32, #tpu.memory_space<vmem>>, %arg10: memref<1x128xf32, #tpu.memory_space<vmem>>, %arg11: memref<1x128xf32, #tpu.memory_space<vmem>>, %arg12: memref<8x128xf32, #tpu.memory_space<vmem>>) attributes {dimension_semantics = [#tpu.dimension_semantics<parallel>], iteration_bounds = array<i64: 1>, scalar_prefetch = 0 : i64, scratch_operands = 0 : i64, tpu.core_type = #tpu.core_type<tc>, window_params = [{transform_indices = @transform_0, window_bounds = array<i64: 8, 32>}, {pipeline_mode = #tpu.pipeline_mode<synchronous>, transform_indices = @transform_1, window_bounds = array<i64: 32, 128>}, {pipeline_mode = #tpu.pipeline_mode<synchronous>, transform_indices = @transform_2, window_bounds = array<i64: 128, 128>}, {pipeline_mode = #tpu.pipeline_mode<synchronous>, transform_indices = @transform_3, window_bounds = array<i64: 128, 128>}, {pipeline_mode = #tpu.pipeline_mode<synchronous>, transform_indices = @transform_4, window_bounds = array<i64: 128, 128>}, {pipeline_mode = #tpu.pipeline_mode<synchronous>, transform_indices = @transform_5, window_bounds = array<i64: 128, 128>}, {pipeline_mode = #tpu.pipeline_mode<synchronous>, transform_indices = @transform_6, window_bounds = array<i64: 1, 128>}, {pipeline_mode = #tpu.pipeline_mode<synchronous>, transform_indices = @transform_7, window_bounds = array<i64: 1, 128>}, {pipeline_mode = #tpu.pipeline_mode<synchronous>, transform_indices = @transform_8, window_bounds = array<i64: 1, 128>}, {pipeline_mode = #tpu.pipeline_mode<synchronous>, transform_indices = @transform_9, window_bounds = array<i64: 1, 128>}, {pipeline_mode = #tpu.pipeline_mode<synchronous>, transform_indices = @transform_10, window_bounds = array<i64: 1, 128>}, {transform_indices = @transform_11, window_bounds = array<i64: 8, 128>}]} {
    %c0 = arith.constant 0 : index
    %c0_0 = arith.constant 0 : index
    %0 = vector.load %arg1[%c0, %c0_0] : memref<8x32xf32, #tpu.memory_space<vmem>>, vector<8x32xf32>
    %c0_1 = arith.constant 0 : index
    %c0_2 = arith.constant 0 : index
    %1 = vector.load %arg2[%c0_1, %c0_2] : memref<32x128xbf16, #tpu.memory_space<vmem>>, vector<32x128xbf16>
    %c0_3 = arith.constant 0 : index
    %c0_4 = arith.constant 0 : index
    %2 = vector.load %arg7[%c0_3, %c0_4] : memref<1x128xf32, #tpu.memory_space<vmem>>, vector<1x128xf32>
    %3 = arith.truncf %0 : vector<8x32xf32> to vector<8x32xbf16>
    %cst = arith.constant dense<0.000000e+00> : vector<8x128xf32>
    %4 = tpu.matmul %3, %1, %cst {dimension_numbers = #tpu.dot_dimension_numbers<[1], [0], [0], [1], [0, 0, 1, 1], [], []>} : vector<8x32xbf16>, vector<32x128xbf16>, vector<8x128xf32> -> vector<8x128xf32>
    %5 = vector.broadcast %2 : vector<1x128xf32> to vector<8x128xf32>
    %6 = arith.addf %4, %5 : vector<8x128xf32>
    %cst_5 = arith.constant -1.59576917 : f32
    %7 = vector.broadcast %cst_5 : f32 to vector<8x128xf32>
    %8 = arith.mulf %7, %6 : vector<8x128xf32>
    %9 = arith.mulf %6, %6 : vector<8x128xf32>
    %cst_6 = arith.constant 4.471500e-02 : f32
    %10 = vector.broadcast %cst_6 : f32 to vector<8x128xf32>
    %11 = arith.mulf %10, %9 : vector<8x128xf32>
    %cst_7 = arith.constant 1.000000e+00 : f32
    %12 = vector.broadcast %cst_7 : f32 to vector<8x128xf32>
    %13 = arith.addf %12, %11 : vector<8x128xf32>
    %14 = arith.mulf %8, %13 : vector<8x128xf32>
    %15 = math.exp %14 : vector<8x128xf32>
    %cst_8 = arith.constant 1.000000e+00 : f32
    %16 = vector.broadcast %cst_8 : f32 to vector<8x128xf32>
    %17 = arith.addf %16, %15 : vector<8x128xf32>
    %18 = arith.divf %6, %17 : vector<8x128xf32>
    %19 = tpu.iota {dimensions = array<i32: 0>} : vector<32x128xi32>
    %20 = tpu.iota {dimensions = array<i32: 1>} : vector<32x128xi32>
    %21 = arith.cmpi eq, %19, %20 : vector<32x128xi32>
    %22 = arith.extui %21 : vector<32x128xi1> to vector<32x128xi32>
    %23 = arith.sitofp %22 : vector<32x128xi32> to vector<32x128xf32>
    %cst_9 = arith.constant dense<0.000000e+00> : vector<8x128xf32>
    %24 = tpu.matmul %0, %23, %cst_9 {dimension_numbers = #tpu.dot_dimension_numbers<[1], [0], [0], [1], [0, 0, 1, 1], [], []>} : vector<8x32xf32>, vector<32x128xf32>, vector<8x128xf32> -> vector<8x128xf32>
    %25 = arith.addf %18, %24 : vector<8x128xf32>
    %c0_10 = arith.constant 0 : index
    %c0_11 = arith.constant 0 : index
    %26 = vector.load %arg3[%c0_10, %c0_11] : memref<128x128xbf16, #tpu.memory_space<vmem>>, vector<128x128xbf16>
    %c0_12 = arith.constant 0 : index
    %c0_13 = arith.constant 0 : index
    %27 = vector.load %arg8[%c0_12, %c0_13] : memref<1x128xf32, #tpu.memory_space<vmem>>, vector<1x128xf32>
    %28 = arith.truncf %25 : vector<8x128xf32> to vector<8x128xbf16>
    %cst_14 = arith.constant dense<0.000000e+00> : vector<8x128xf32>
    %29 = tpu.matmul %28, %26, %cst_14 {dimension_numbers = #tpu.dot_dimension_numbers<[1], [0], [0], [1], [0, 0, 1, 1], [], []>} : vector<8x128xbf16>, vector<128x128xbf16>, vector<8x128xf32> -> vector<8x128xf32>
    %30 = vector.broadcast %27 : vector<1x128xf32> to vector<8x128xf32>
    %31 = arith.addf %29, %30 : vector<8x128xf32>
    %cst_15 = arith.constant -1.59576917 : f32
    %32 = vector.broadcast %cst_15 : f32 to vector<8x128xf32>
    %33 = arith.mulf %32, %31 : vector<8x128xf32>
    %34 = arith.mulf %31, %31 : vector<8x128xf32>
    %cst_16 = arith.constant 4.471500e-02 : f32
    %35 = vector.broadcast %cst_16 : f32 to vector<8x128xf32>
    %36 = arith.mulf %35, %34 : vector<8x128xf32>
    %cst_17 = arith.constant 1.000000e+00 : f32
    %37 = vector.broadcast %cst_17 : f32 to vector<8x128xf32>
    %38 = arith.addf %37, %36 : vector<8x128xf32>
    %39 = arith.mulf %33, %38 : vector<8x128xf32>
    %40 = math.exp %39 : vector<8x128xf32>
    %cst_18 = arith.constant 1.000000e+00 : f32
    %41 = vector.broadcast %cst_18 : f32 to vector<8x128xf32>
    %42 = arith.addf %41, %40 : vector<8x128xf32>
    %43 = arith.divf %31, %42 : vector<8x128xf32>
    %44 = arith.addf %43, %25 : vector<8x128xf32>
    %c0_19 = arith.constant 0 : index
    %c0_20 = arith.constant 0 : index
    %45 = vector.load %arg4[%c0_19, %c0_20] : memref<128x128xbf16, #tpu.memory_space<vmem>>, vector<128x128xbf16>
    %c0_21 = arith.constant 0 : index
    %c0_22 = arith.constant 0 : index
    %46 = vector.load %arg9[%c0_21, %c0_22] : memref<1x128xf32, #tpu.memory_space<vmem>>, vector<1x128xf32>
    %47 = arith.truncf %44 : vector<8x128xf32> to vector<8x128xbf16>
    %cst_23 = arith.constant dense<0.000000e+00> : vector<8x128xf32>
    %48 = tpu.matmul %47, %45, %cst_23 {dimension_numbers = #tpu.dot_dimension_numbers<[1], [0], [0], [1], [0, 0, 1, 1], [], []>} : vector<8x128xbf16>, vector<128x128xbf16>, vector<8x128xf32> -> vector<8x128xf32>
    %49 = vector.broadcast %46 : vector<1x128xf32> to vector<8x128xf32>
    %50 = arith.addf %48, %49 : vector<8x128xf32>
    %cst_24 = arith.constant -1.59576917 : f32
    %51 = vector.broadcast %cst_24 : f32 to vector<8x128xf32>
    %52 = arith.mulf %51, %50 : vector<8x128xf32>
    %53 = arith.mulf %50, %50 : vector<8x128xf32>
    %cst_25 = arith.constant 4.471500e-02 : f32
    %54 = vector.broadcast %cst_25 : f32 to vector<8x128xf32>
    %55 = arith.mulf %54, %53 : vector<8x128xf32>
    %cst_26 = arith.constant 1.000000e+00 : f32
    %56 = vector.broadcast %cst_26 : f32 to vector<8x128xf32>
    %57 = arith.addf %56, %55 : vector<8x128xf32>
    %58 = arith.mulf %52, %57 : vector<8x128xf32>
    %59 = math.exp %58 : vector<8x128xf32>
    %cst_27 = arith.constant 1.000000e+00 : f32
    %60 = vector.broadcast %cst_27 : f32 to vector<8x128xf32>
    %61 = arith.addf %60, %59 : vector<8x128xf32>
    %62 = arith.divf %50, %61 : vector<8x128xf32>
    %63 = arith.addf %62, %44 : vector<8x128xf32>
    %c0_28 = arith.constant 0 : index
    %c0_29 = arith.constant 0 : index
    %64 = vector.load %arg5[%c0_28, %c0_29] : memref<128x128xbf16, #tpu.memory_space<vmem>>, vector<128x128xbf16>
    %c0_30 = arith.constant 0 : index
    %c0_31 = arith.constant 0 : index
    %65 = vector.load %arg10[%c0_30, %c0_31] : memref<1x128xf32, #tpu.memory_space<vmem>>, vector<1x128xf32>
    %66 = arith.truncf %63 : vector<8x128xf32> to vector<8x128xbf16>
    %cst_32 = arith.constant dense<0.000000e+00> : vector<8x128xf32>
    %67 = tpu.matmul %66, %64, %cst_32 {dimension_numbers = #tpu.dot_dimension_numbers<[1], [0], [0], [1], [0, 0, 1, 1], [], []>} : vector<8x128xbf16>, vector<128x128xbf16>, vector<8x128xf32> -> vector<8x128xf32>
    %68 = vector.broadcast %65 : vector<1x128xf32> to vector<8x128xf32>
    %69 = arith.addf %67, %68 : vector<8x128xf32>
    %cst_33 = arith.constant -1.59576917 : f32
    %70 = vector.broadcast %cst_33 : f32 to vector<8x128xf32>
    %71 = arith.mulf %70, %69 : vector<8x128xf32>
    %72 = arith.mulf %69, %69 : vector<8x128xf32>
    %cst_34 = arith.constant 4.471500e-02 : f32
    %73 = vector.broadcast %cst_34 : f32 to vector<8x128xf32>
    %74 = arith.mulf %73, %72 : vector<8x128xf32>
    %cst_35 = arith.constant 1.000000e+00 : f32
    %75 = vector.broadcast %cst_35 : f32 to vector<8x128xf32>
    %76 = arith.addf %75, %74 : vector<8x128xf32>
    %77 = arith.mulf %71, %76 : vector<8x128xf32>
    %78 = math.exp %77 : vector<8x128xf32>
    %cst_36 = arith.constant 1.000000e+00 : f32
    %79 = vector.broadcast %cst_36 : f32 to vector<8x128xf32>
    %80 = arith.addf %79, %78 : vector<8x128xf32>
    %81 = arith.divf %69, %80 : vector<8x128xf32>
    %82 = arith.addf %81, %63 : vector<8x128xf32>
    %c0_37 = arith.constant 0 : index
    %c0_38 = arith.constant 0 : index
    %83 = vector.load %arg6[%c0_37, %c0_38] : memref<128x128xbf16, #tpu.memory_space<vmem>>, vector<128x128xbf16>
    %c0_39 = arith.constant 0 : index
    %c0_40 = arith.constant 0 : index
    %84 = vector.load %arg11[%c0_39, %c0_40] : memref<1x128xf32, #tpu.memory_space<vmem>>, vector<1x128xf32>
    %85 = arith.truncf %82 : vector<8x128xf32> to vector<8x128xbf16>
    %cst_41 = arith.constant dense<0.000000e+00> : vector<8x128xf32>
    %86 = tpu.matmul %85, %83, %cst_41 {dimension_numbers = #tpu.dot_dimension_numbers<[1], [0], [0], [1], [0, 0, 1, 1], [], []>} : vector<8x128xbf16>, vector<128x128xbf16>, vector<8x128xf32> -> vector<8x128xf32>
    %87 = vector.broadcast %84 : vector<1x128xf32> to vector<8x128xf32>
    %88 = arith.addf %86, %87 : vector<8x128xf32>
    %cst_42 = arith.constant -1.59576917 : f32
    %89 = vector.broadcast %cst_42 : f32 to vector<8x128xf32>
    %90 = arith.mulf %89, %88 : vector<8x128xf32>
    %91 = arith.mulf %88, %88 : vector<8x128xf32>
    %cst_43 = arith.constant 4.471500e-02 : f32
    %92 = vector.broadcast %cst_43 : f32 to vector<8x128xf32>
    %93 = arith.mulf %92, %91 : vector<8x128xf32>
    %cst_44 = arith.constant 1.000000e+00 : f32
    %94 = vector.broadcast %cst_44 : f32 to vector<8x128xf32>
    %95 = arith.addf %94, %93 : vector<8x128xf32>
    %96 = arith.mulf %90, %95 : vector<8x128xf32>
    %97 = math.exp %96 : vector<8x128xf32>
    %cst_45 = arith.constant 1.000000e+00 : f32
    %98 = vector.broadcast %cst_45 : f32 to vector<8x128xf32>
    %99 = arith.addf %98, %97 : vector<8x128xf32>
    %100 = arith.divf %88, %99 : vector<8x128xf32>
    %c0_46 = arith.constant 0 : index
    %c0_47 = arith.constant 0 : index
    %101 = vector.load %arg12[%c0_46, %c0_47] : memref<8x128xf32, #tpu.memory_space<vmem>>, vector<8x128xf32>
    tpu.vector_store %arg12[%c0_46, %c0_47], %100 {strides = array<i32>} : memref<8x128xf32, #tpu.memory_space<vmem>>, vector<8x128xf32>,
    return
  }
  func.func @transform_0(%arg0: i32) -> (i32, i32) {
    %c0_i32 = arith.constant 0 : i32
    %c0_i32_0 = arith.constant 0 : i32
    return %arg0, %c0_i32 : i32, i32
  }
  func.func @transform_1(%arg0: i32) -> (i32, i32) {
    %c0_i32 = arith.constant 0 : i32
    %c0_i32_0 = arith.constant 0 : i32
    %c0_i32_1 = arith.constant 0 : i32
    return %c0_i32, %c0_i32_0 : i32, i32
  }
  func.func @transform_2(%arg0: i32) -> (i32, i32) {
    %c0_i32 = arith.constant 0 : i32
    %c0_i32_0 = arith.constant 0 : i32
    %c0_i32_1 = arith.constant 0 : i32
    return %c0_i32, %c0_i32_0 : i32, i32
  }
  func.func @transform_3(%arg0: i32) -> (i32, i32) {
    %c0_i32 = arith.constant 0 : i32
    %c0_i32_0 = arith.constant 0 : i32
    %c0_i32_1 = arith.constant 0 : i32
    return %c0_i32, %c0_i32_0 : i32, i32
  }
  func.func @transform_4(%arg0: i32) -> (i32, i32) {
    %c0_i32 = arith.constant 0 : i32
    %c0_i32_0 = arith.constant 0 : i32
    %c0_i32_1 = arith.constant 0 : i32
    return %c0_i32, %c0_i32_0 : i32, i32
  }
  func.func @transform_5(%arg0: i32) -> (i32, i32) {
    %c0_i32 = arith.constant 0 : i32
    %c0_i32_0 = arith.constant 0 : i32
    %c0_i32_1 = arith.constant 0 : i32
    return %c0_i32, %c0_i32_0 : i32, i32
  }
  func.func @transform_6(%arg0: i32) -> (i32, i32) {
    %c0_i32 = arith.constant 0 : i32
    %c0_i32_0 = arith.constant 0 : i32
    %c0_i32_1 = arith.constant 0 : i32
    return %c0_i32, %c0_i32_0 : i32, i32
  }
  func.func @transform_7(%arg0: i32) -> (i32, i32) {
    %c0_i32 = arith.constant 0 : i32
    %c0_i32_0 = arith.constant 0 : i32
    %c0_i32_1 = arith.constant 0 : i32
    return %c0_i32, %c0_i32_0 : i32, i32
  }
  func.func @transform_8(%arg0: i32) -> (i32, i32) {
    %c0_i32 = arith.constant 0 : i32
    %c0_i32_0 = arith.constant 0 : i32
    %c0_i32_1 = arith.constant 0 : i32
    return %c0_i32, %c0_i32_0 : i32, i32
  }
  func.func @transform_9(%arg0: i32) -> (i32, i32) {
    %c0_i32 = arith.constant 0 : i32
    %c0_i32_0 = arith.constant 0 : i32
    %c0_i32_1 = arith.constant 0 : i32
    return %c0_i32, %c0_i32_0 : i32, i32
  }
  func.func @transform_10(%arg0: i32) -> (i32, i32) {
    %c0_i32 = arith.constant 0 : i32
    %c0_i32_0 = arith.constant 0 : i32
    %c0_i32_1 = arith.constant 0 : i32
    return %c0_i32, %c0_i32_0 : i32, i32
  }
  func.func @transform_11(%arg0: i32) -> (i32, i32) {
    %c0_i32 = arith.constant 0 : i32
    %c0_i32_0 = arith.constant 0 : i32
    return %arg0, %c0_i32 : i32, i32
  }
}

</mosaic_0001>

<bundles_post_ra>
// kernel: tpu_custom_call.1
= control target key start
LH: loop header
LB: loop body
LE: loop exit
PB: predicated region body
PF: predicated region fallthrough
CT: control target
= control target key end

     0   :  { %16 = vsyncpa [#allocation3], 0  ;;  %s1464_s0 = inlined_call_operand.hbm [shape: f32[8,32], index: 0, kind: input, shape index: {}]   ;;  %s1465_s1 = inlined_call_operand.hbm [shape: bf16[32,128], index: 1, kind: input, shape index: {}]   ;;  %s1466_s2 = inlined_call_operand.hbm [shape: bf16[128,128], index: 2, kind: input, shape index: {}]   ;;  %s1467_s3 = inlined_call_operand.hbm [shape: bf16[128,128], index: 3, kind: input, shape index: {}]   ;;  %s1468_s4 = inlined_call_operand.hbm [shape: bf16[128,128], index: 4, kind: input, shape index: {}]   ;;  %s1469_s5 = inlined_call_operand.hbm [shape: bf16[128,128], index: 5, kind: input, shape index: {}]   ;;  %s1470_s6 = inlined_call_operand.vmem [shape: f32[1,128], index: 6, kind: input, shape index: {}]   ;;  %s1471_s7 = inlined_call_operand.vmem [shape: f32[1,128], index: 7, kind: input, shape index: {}]   ;;  %s1472_s8 = inlined_call_operand.vmem [shape: f32[1,128], index: 8, kind: input, shape index: {}]   ;;  %s1473_s9 = inlined_call_operand.vmem [shape: f32[1,128], index: 9, kind: input, shape index: {}]   ;;  %s1474_s10 = inlined_call_operand.vmem [shape: f32[1,128], index: 10, kind: input, shape index: {}]   ;;  %s1475_s11 = inlined_call_operand.hbm [shape: f32[8,128], index: 11, kind: output, shape index: {}]  }
   0x1   :  { %17 = vsyncpa [#allocation6], 0 }
   0x2   :  { %18 = vsyncpa [#allocation9], 0 }
   0x3   :  { %19 = vsyncpa [#allocation12], 0 }
   0x4   :  { %20 = vsyncpa [#allocation4], 0  ;;  %s1231_s17 = smov [#allocation5]   ;;  %s1067_s21 = scalar_lea.hbm %s1465_s1, 256 }
   0x5   :  { %s36_s18 = sshll.u32 %s1231_s17, 4  ;;  %p1068_p0 = scmp.ne.s32.totalorder %s1465_s1, %s1067_s21  ;;  %s37_s18 = int_to_ptr.vmem [resolvable:$true] %s36_s18 }
   0x6   :  { %p1071_p1 = scmp.lt.u32.totalorder %s1067_s21, %s1465_s1 }
   0x8   :  { %p1073_p2 = pnand %p1071_p1, %p1068_p0 }
   0xa   :  { %1076 = shalt.err (!%p1073_p2)
}
   0xb   :  { %s1077_s26 = scalar_lea.vmem %s37_s18, 256  ;;  %p1082_p4 = scmp.lt.s32.totalorder %s37_s18, %s37_s18 }
   0xc   :  { %p1078_p3 = scmp.ne.s32.totalorder %s37_s18, %s1077_s26  ;;  %p1083_p5 = scmp.lt.s32.totalorder %s1077_s26, %s1077_s26 }
   0xe   :  { %p1084_p6 = por %p1083_p5, %p1082_p4 }
  0x10   :  { %p1085_p7 = pnand %p1084_p6, %p1078_p3 }
  0x12   :  { %1088 = shalt.err (!%p1085_p7)
}
  0x13   :  { %s1232_s27 = smov 64   ;;  %s1233_s28 = smov 4  }
  0x14   :  { %42 = dma.hbm_to_vmem [thread:$0]  %s1465_s1, 256, %s37_s18, [#allocation6], %s1232_s27, %s1232_s27, %s1233_s28  }
  0x15   :  { %s1234_s12 = smov [#allocation8]   ;;  %s1235_s14 = smov [#allocation2]  }
  0x16   :  { %s60_s13 = sshll.u32 %s1234_s12, 4  ;;  %s27_s15 = sshll.u32 %s1235_s14, 4  ;;  %s61_s13 = int_to_ptr.vmem [resolvable:$true] %s60_s13  ;;  %s28_s15 = int_to_ptr.vmem [resolvable:$true] %s27_s15 }
  0x17   :  { %s1089_s19 = scalar_lea.hbm %s1467_s3, 1024 }
  0x18   :  { %p1090_p8 = scmp.ne.s32.totalorder %s1467_s3, %s1089_s19  ;;  %p1093_p9 = scmp.lt.u32.totalorder %s1089_s19, %s1467_s3 }
  0x1a   :  { %p1095_p10 = pnand %p1093_p9, %p1090_p8 }
  0x1c   :  { %1098 = shalt.err (!%p1095_p10)
}
  0x1d   :  { %s1099_s1 = scalar_lea.vmem %s61_s13, 1024  ;;  %p1104_p12 = scmp.lt.s32.totalorder %s61_s13, %s61_s13 }
  0x1e   :  { %p1100_p11 = scmp.ne.s32.totalorder %s61_s13, %s1099_s1  ;;  %p1105_p13 = scmp.lt.s32.totalorder %s1099_s1, %s1099_s1 }
  0x20   :  { %p1106_p0 = por %p1105_p13, %p1104_p12 }
  0x22   :  { %p1107_p1 = pnand %p1106_p0, %p1100_p11 }
  0x24   :  { %1110 = shalt.err (!%p1107_p1)
}
  0x25   :  { %66 = dma.hbm_to_vmem [thread:$0]  %s1467_s3, 1024, %s61_s13, [#allocation9], %s1232_s27, %s1232_s27, %s1233_s28  }
  0x26   :  { %s1111_s29 = scalar_lea.hbm %s1464_s0, 128 }
  0x27   :  { %p1112_p2 = scmp.ne.s32.totalorder %s1464_s0, %s1111_s29  ;;  %p1115_p3 = scmp.lt.u32.totalorder %s1111_s29, %s1464_s0 }
  0x29   :  { %p1117_p4 = pnand %p1115_p3, %p1112_p2 }
  0x2b   :  { %1120 = shalt.err (!%p1117_p4)
}
  0x2c   :  { %s1121_s17 = scalar_lea.vmem %s28_s15, 128  ;;  %p1126_p6 = scmp.lt.s32.totalorder %s28_s15, %s28_s15 }
  0x2d   :  { %p1122_p5 = scmp.ne.s32.totalorder %s28_s15, %s1121_s17  ;;  %p1127_p7 = scmp.lt.s32.totalorder %s1121_s17, %s1121_s17 }
  0x2f   :  { %p1128_p8 = por %p1127_p7, %p1126_p6 }
  0x31   :  { %p1129_p9 = pnand %p1128_p8, %p1122_p5 }
  0x33   :  { %1132 = shalt.err (!%p1129_p9)
}
  0x34   :  { %30 = dma.hbm_to_vmem [thread:$0]  %s1464_s0, 128, %s28_s15, [#allocation3]  }
  0x35   :  { %s1236_s19 = smov [#allocation7]   ;;  %s1237_s21 = smov [#allocation10]  }
  0x36   :  { %s48_s20 = sshll.u32 %s1236_s19, 4  ;;  %s72_s22 = sshll.u32 %s1237_s21, 4  ;;  %s49_s20 = int_to_ptr.vmem [resolvable:$true] %s48_s20  ;;  %s73_s22 = int_to_ptr.vmem [resolvable:$true] %s72_s22 }
  0x37   :  { %s1133_s18 = scalar_lea.hbm %s1466_s2, 1024 }
  0x38   :  { %p1134_p10 = scmp.ne.s32.totalorder %s1466_s2, %s1133_s18  ;;  %p1137_p11 = scmp.lt.u32.totalorder %s1133_s18, %s1466_s2 }
  0x3a   :  { %p1139_p12 = pnand %p1137_p11, %p1134_p10 }
  0x3c   :  { %1142 = shalt.err (!%p1139_p12)
}
  0x3d   :  { %s1143_s0 = scalar_lea.vmem %s49_s20, 1024  ;;  %p1148_p0 = scmp.lt.s32.totalorder %s49_s20, %s49_s20 }
  0x3e   :  { %p1144_p13 = scmp.ne.s32.totalorder %s49_s20, %s1143_s0  ;;  %p1149_p1 = scmp.lt.s32.totalorder %s1143_s0, %s1143_s0 }
  0x40   :  { %p1150_p2 = por %p1149_p1, %p1148_p0 }
  0x42   :  { %p1151_p3 = pnand %p1150_p2, %p1144_p13 }
  0x44   :  { %1154 = shalt.err (!%p1151_p3)
}
  0x45   :  { %54 = dma.hbm_to_vmem [thread:$0]  %s1466_s2, 1024, %s49_s20, [#allocation6], %s1232_s27, %s1232_s27, %s1233_s28  }
  0x46   :  { %s1155_s16 = scalar_lea.hbm %s1468_s4, 1024 }
  0x47   :  { %p1156_p4 = scmp.ne.s32.totalorder %s1468_s4, %s1155_s16  ;;  %p1159_p5 = scmp.lt.u32.totalorder %s1155_s16, %s1468_s4 }
  0x49   :  { %p1161_p6 = pnand %p1159_p5, %p1156_p4 }
  0x4b   :  { %1164 = shalt.err (!%p1161_p6)
}
  0x4c   :  { %s1165_s21 = scalar_lea.vmem %s73_s22, 1024  ;;  %p1170_p8 = scmp.lt.s32.totalorder %s73_s22, %s73_s22 }
  0x4d   :  { %p1166_p7 = scmp.ne.s32.totalorder %s73_s22, %s1165_s21  ;;  %p1171_p9 = scmp.lt.s32.totalorder %s1165_s21, %s1165_s21 }
  0x4f   :  { %p1172_p10 = por %p1171_p9, %p1170_p8 }
  0x51   :  { %p1173_p11 = pnand %p1172_p10, %p1166_p7 }
  0x53   :  { %1176 = shalt.err (!%p1173_p11)
}
  0x54   :  { %78 = dma.hbm_to_vmem [thread:$0]  %s1468_s4, 1024, %s73_s22, [#allocation9], %s1232_s27, %s1232_s27, %s1233_s28  }
  0x55   :  { %s1238_s23 = smov [#allocation11]   ;;  %s1177_s25 = scalar_lea.hbm %s1469_s5, 1024 }
  0x56   :  { %s84_s1 = sshll.u32 %s1238_s23, 4  ;;  %p1178_p12 = scmp.ne.s32.totalorder %s1469_s5, %s1177_s25  ;;  %s85_s1 = int_to_ptr.vmem [resolvable:$true] %s84_s1 }
  0x57   :  { %p1181_p13 = scmp.lt.u32.totalorder %s1177_s25, %s1469_s5 }
  0x59   :  { %p1183_p0 = pnand %p1181_p13, %p1178_p12 }
  0x5b   :  { %1186 = shalt.err (!%p1183_p0)
}
  0x5c   :  { %s1187_s30 = scalar_lea.vmem %s85_s1, 1024  ;;  %p1192_p2 = scmp.lt.s32.totalorder %s85_s1, %s85_s1 }
  0x5d   :  { %p1188_p1 = scmp.ne.s32.totalorder %s85_s1, %s1187_s30  ;;  %p1193_p3 = scmp.lt.s32.totalorder %s1187_s30, %s1187_s30 }
  0x5f   :  { %p1194_p4 = por %p1193_p3, %p1192_p2 }
  0x61   :  { %p1195_p5 = pnand %p1194_p4, %p1188_p1 }
  0x63   :  { %1198 = shalt.err (!%p1195_p5)
}
  0x64   :  { %90 = dma.hbm_to_vmem [thread:$0]  %s1469_s5, 1024, %s85_s1, [#allocation12], %s1232_s27, %s1232_s27, %s1233_s28  }
  0x65   :  { %1221 = dma.done.wait [#allocation3], 128  }
  0x66   :  { %1222 = vsyncadd [#allocation3], 4294967168 }
  0x67   :  { %1223 = dma.done.wait [#allocation6], 1280  }
  0x68   :  { %1224 = vsyncadd [#allocation6], 4294966016 }
  0x69   :  { %1225 = dma.done.wait [#allocation9], 2048  }
  0x6a   :  { %1226 = vsyncadd [#allocation9], 4294965248 }
  0x6b   :  { %1227 = dma.done.wait [#allocation12], 1024  }
  0x6c   :  { %1228 = vsyncadd [#allocation12], 4294966272  ;;  %v1239_v0 = vmov 0.0   ;;  %vm1240_vm0 = vmmov 0   ;;  %v199_v1 = vlaneseq  ;;  %v1241_v2 = vmov 0.0|0.0   ;;  %v1013_v8 = vld [vmem:[#allocation5] sm:$0xff]  }
  0x6d   :  { %895 = vmatprep.subr.bf16.mxu0 %v1239_v0  ;;  %899 = vmatprep.mubr.msk.bf16.mxu0 %vm1240_vm0, %v1239_v0  ;;  %v1014_v9 = vld [vmem:[#allocation5 + $0x8] sm:$0xff]   ;;  %v120_v10 = vld [vmem:[#allocation2] sm:$0xff]  ;;  %vm145_vm6 = vcmask 261120   ;;  %v1242_v11 = vmov 1.0|1.0   ;;  %v1015_v13 = vld [vmem:[#allocation7] sm:$0xff]  }
  0x6e   :  { %994 = vmatprep.subr.bf16.mxu1 %v1241_v2  ;;  %911 = vmatprep.mubr.msk.f32.mxu1 %vm1240_vm0, %v1239_v0  ;;  %v200_v3 = vshrl.u32 %v199_v1, 7  ;;  %v205_v4 = vand.u32 127, %v199_v1  ;;  %v126_v12 = vpack.c.bf16 %v120_v10, %v120_v10  ;;  %v1016_v14 = vld [vmem:[#allocation7 + $0x8] sm:$0xff]   ;;  %v1017_v15 = vld [vmem:[#allocation7 + $0x10] sm:$0xff]   ;;  %v1018_v16 = vld [vmem:[#allocation7 + $0x18] sm:$0xff]   ;;  %s1243_s17 = smov [#allocation13]  }
  0x6f   :  { %896 = vmatpush3.bf16.msra.mxu0 %v1013_v8  ;;  %v1019_v17 = vld [vmem:[#allocation7 + $0x20] sm:$0xff]   ;;  %v1020_v18 = vld [vmem:[#allocation7 + $0x28] sm:$0xff]   ;;  %v1021_v19 = vld [vmem:[#allocation7 + $0x30] sm:$0xff]   ;;  %s790_s3 = sshll.u32 %s1243_s17, 4  ;;  %s791_s3 = int_to_ptr.vmem [resolvable:$true] %s790_s3 }
  0x70   :  { %v201_v5 = vadd.s32 8, %v200_v3  ;;  %v202_v6 = vadd.s32 16, %v200_v3  ;;  %v203_v7 = vadd.s32 24, %v200_v3  ;;  %vm206_vm1 = vcmp.eq.s32.totalorder %v200_v3, %v205_v4  ;;  %897 = vmatprep.subr.bf16.mxu0 %v1239_v0  ;;  %v1022_v20 = vld [vmem:[#allocation7 + $0x38] sm:$0xff]   ;;  %v802_v21 = vld [vmem:[%s1470_s6] ss:$0 sm:$0xff]  ;;  %p1204_p7 = scmp.lt.s32.totalorder %s791_s3, %s791_s3 }
  0x71   :  { %v1023_v41 = vld [vmem:[#allocation8] sm:$0xff]   ;;  %v1024_v42 = vld [vmem:[#allocation8 + $0x8] sm:$0xff]   ;;  %v1025_v43 = vld [vmem:[#allocation8 + $0x10] sm:$0xff]  }
  0x72   :  { %vm207_vm2 = vcmp.eq.s32.totalorder %v201_v5, %v205_v4  ;;  %vm208_vm3 = vcmp.eq.s32.totalorder %v202_v6, %v205_v4  ;;  %vm209_vm4 = vcmp.eq.s32.totalorder %v203_v7, %v205_v4  ;;  %v1026_v44 = vld [vmem:[#allocation8 + $0x18] sm:$0xff]   ;;  %v1027_v45 = vld [vmem:[#allocation8 + $0x20] sm:$0xff]   ;;  %v1028_v46 = vld [vmem:[#allocation8 + $0x28] sm:$0xff]  }
  0x73   :  { %vm995_vm5 = vmpackc.low %vm207_vm2, %vm206_vm1  ;;  %898 = vmatpush3.bf16.msra.mxu0 %v1014_v9  ;;  %v1029_v47 = vld [vmem:[#allocation8 + $0x30] sm:$0xff]   ;;  %v1030_v48 = vld [vmem:[#allocation8 + $0x38] sm:$0xff]  }
  0x74   :  { %996 = vmatpush3.bf16.msk.msra.mxu1 %vm995_vm5, %v1242_v11  ;;  %vm998_vm7 = vmpackc.low %vm209_vm4, %vm208_vm3  ;;  %914 = vmatprep.subr.bf16.mxu0 %v1239_v0  ;;  %v815_v49 = vld [vmem:[%s1471_s7] ss:$0 sm:$0xff]  ;;  %v1031_v4 = vld [vmem:[#allocation10] sm:$0xff]  }
  0x75   :  { %997 = vmatprep.subr.bf16.mxu1 %v1241_v2  ;;  %v1032_v5 = vld [vmem:[#allocation10 + $0x8] sm:$0xff]   ;;  %v1033_v6 = vld [vmem:[#allocation10 + $0x10] sm:$0xff]   ;;  %v1034_v7 = vld [vmem:[#allocation10 + $0x18] sm:$0xff]  }
  0x76   :  { %900 = vmatmul.mubr.msk.bf16.vlgmr.msra.gmra.mrb[0].mxu0 %vm145_vm6, %v126_v12  ;;  %v1035_v8 = vld [vmem:[#allocation10 + $0x20] sm:$0xff]   ;;  %v1036_v9 = vld [vmem:[#allocation10 + $0x28] sm:$0xff]  }
  0x77   :  { %930 = vmatprep.mubr.msk.bf16.mxu0 %vm1240_vm0, %v1239_v0  ;;  %915 = vmatpush3.bf16.msra.mxu0 %v1015_v13  ;;  %v824_v12 = vld [vmem:[%s1472_s8] ss:$0 sm:$0xff] }
  0x78   :  { %999 = vmatpush3.bf16.msk.msra.mxu1 %vm998_vm7, %v1242_v11  ;;  %916 = vmatprep.subr.bf16.mxu0 %v1239_v0  ;;  %v1038_v11 = vld [vmem:[#allocation10 + $0x38] sm:$0xff]  }
  0x79   :  { %934 = vmatprep.subr.bf16.mxu1 %v1239_v0 }
  0x7b   :  { %912 = vmatmul.mubr.msk.f32.vlgmr.msra.gmra.mrb[0].mxu1 %vm145_vm6, %v120_v10  ;;  %917 = vmatpush3.bf16.msra.mxu0 %v1016_v14  ;;  %v1037_v10 = vld [vmem:[#allocation10 + $0x30] sm:$0xff]  }
  0x7c   :  { %950 = vmatprep.mubr.msk.bf16.mxu1 %vm1240_vm0, %v1239_v0  ;;  %918 = vmatprep.subr.bf16.mxu0 %v1239_v0 }
  0x7d   :  { %935 = vmatpush3.bf16.msra.mxu1 %v1023_v41 }
  0x7e   :  { %936 = vmatprep.subr.bf16.mxu1 %v1239_v0 }
  0x7f   :  { %919 = vmatpush3.bf16.msra.mxu0 %v1017_v15 }
  0x80   :  { %920 = vmatprep.subr.bf16.mxu0 %v1239_v0 }
  0x81   :  { %937 = vmatpush3.bf16.msra.mxu1 %v1024_v42 }
  0x82   :  { %938 = vmatprep.subr.bf16.mxu1 %v1239_v0 }
  0x83   :  { %921 = vmatpush3.bf16.msra.mxu0 %v1018_v16 }
  0x84   :  { %922 = vmatprep.subr.bf16.mxu0 %v1239_v0 }
  0x85   :  { %939 = vmatpush3.bf16.msra.mxu1 %v1025_v43 }
  0x86   :  { %940 = vmatprep.subr.bf16.mxu1 %v1239_v0 }
  0x87   :  { %923 = vmatpush3.bf16.msra.mxu0 %v1019_v17 }
  0x88   :  { %924 = vmatprep.subr.bf16.mxu0 %v1239_v0 }
  0x89   :  { %941 = vmatpush3.bf16.msra.mxu1 %v1026_v44 }
  0x8a   :  { %942 = vmatprep.subr.bf16.mxu1 %v1239_v0 }
  0x8b   :  { %925 = vmatpush3.bf16.msra.mxu0 %v1020_v18 }
  0x8c   :  { %926 = vmatprep.subr.bf16.mxu0 %v1239_v0 }
  0x8d   :  { %943 = vmatpush3.bf16.msra.mxu1 %v1027_v45 }
  0x8e   :  { %944 = vmatprep.subr.bf16.mxu1 %v1239_v0 }
  0x8f   :  { %927 = vmatpush3.bf16.msra.mxu0 %v1021_v19 }
  0x90   :  { %928 = vmatprep.subr.bf16.mxu0 %v1239_v0 }
  0x91   :  { %945 = vmatpush3.bf16.msra.mxu1 %v1028_v46 }
  0x92   :  { %946 = vmatprep.subr.bf16.mxu1 %v1239_v0 }
  0x93   :  { %929 = vmatpush3.bf16.msra.mxu0 %v1022_v20 }
  0x94   :  { %954 = vmatprep.subr.bf16.mxu0 %v1239_v0 }
  0x95   :  { %947 = vmatpush3.bf16.msra.mxu1 %v1029_v47 }
  0x96   :  { %948 = vmatprep.subr.bf16.mxu1 %v1239_v0 }
  0x99   :  { %949 = vmatpush3.bf16.msra.mxu1 %v1030_v48 }
  0x9a   :  { %974 = vmatprep.subr.bf16.mxu1 %v1239_v0 }
 0x149   :  { %v183_v22 = vpop.f32.mrb[0].mxu0 }
 0x14a   :  { %v184_v23 = vadd.f32 %v802_v21, %v183_v22  ;;  %v901_v24 = vpop.f32.mrb[1].mxu0 }
 0x14b   :  { %v186_v26 = vpop.f32.mrb[2].mxu0 }
 0x14c   :  { %v190_v28 = vmul.f32 %v184_v23, %v184_v23  ;;  %v902_v29 = vpop.f32.mrb[3].mxu0  ;;  %v189_v31 = vmul.f32 -1.5957692, %v184_v23 }
 0x14e   :  { %v287_v25 = vpop.f32.mrb[0].mxu1  ;;  %v191_v30 = vmul.f32 0.044715, %v190_v28 }
 0x14f   :  { %v913_v27 = vpop.f32.mrb[1].mxu1 }
 0x150   :  { %v192_v32 = vadd.f32 1.0, %v191_v30  ;;  %v1039_v30 = vld [vmem:[#allocation11] sm:$0xff]  }
 0x152   :  { %v193_v33 = vmul.f32 %v192_v32, %v189_v31  ;;  %v1040_v31 = vld [vmem:[#allocation11 + $0x8] sm:$0xff]   ;;  %v1041_v32 = vld [vmem:[#allocation11 + $0x10] sm:$0xff]  }
 0x154   :  { %v194_v34 = vmul.f32 1.442695, %v193_v33  ;;  %v1042_v33 = vld [vmem:[#allocation11 + $0x18] sm:$0xff]  }
 0x156   :  { %1047 = vpow2.f32 %v194_v34  ;;  %v1043_v34 = vld [vmem:[#allocation11 + $0x20] sm:$0xff]  }
 0x160   :  { %v1048_v35 = vpop.eup %1047 }
 0x161   :  { %v196_v36 = vadd.f32 1.0, %v1048_v35  ;;  %v1044_v35 = vld [vmem:[#allocation11 + $0x28] sm:$0xff]  }
 0x163   :  { %1049 = vrcp.f32 %v196_v36  ;;  %v1045_v36 = vld [vmem:[#allocation11 + $0x30] sm:$0xff]  }
 0x16d   :  { %v1050_v37 = vpop.eup %1049 }
 0x16e   :  { %v198_v38 = vmul.f32 %v1050_v37, %v184_v23  ;;  %v1046_v37 = vld [vmem:[#allocation11 + $0x38] sm:$0xff]  }
 0x170   :  { %v291_v39 = vadd.f32 %v287_v25, %v198_v38  ;;  %v833_v38 = vld [vmem:[%s1473_s9] ss:$0 sm:$0xff] }
 0x172   :  { %v309_v40 = vpack.c.bf16 %v291_v39, %v291_v39 }
 0x174   :  { %931 = vmatmul.mubr.bf16.vlgmr.msra.gmra.mrb[4].mxu0 %v309_v40 }
 0x175   :  { %970 = vmatprep.mubr.msk.bf16.mxu0 %vm1240_vm0, %v1239_v0  ;;  %955 = vmatpush3.bf16.msra.mxu0 %v1031_v4 }
 0x176   :  { %956 = vmatprep.subr.bf16.mxu0 %v1239_v0 }
 0x179   :  { %957 = vmatpush3.bf16.msra.mxu0 %v1032_v5 }
 0x17a   :  { %958 = vmatprep.subr.bf16.mxu0 %v1239_v0 }
 0x17d   :  { %959 = vmatpush3.bf16.msra.mxu0 %v1033_v6 }
 0x17e   :  { %960 = vmatprep.subr.bf16.mxu0 %v1239_v0 }
 0x181   :  { %961 = vmatpush3.bf16.msra.mxu0 %v1034_v7 }
 0x182   :  { %962 = vmatprep.subr.bf16.mxu0 %v1239_v0 }
 0x185   :  { %963 = vmatpush3.bf16.msra.mxu0 %v1035_v8 }
 0x186   :  { %964 = vmatprep.subr.bf16.mxu0 %v1239_v0 }
 0x189   :  { %965 = vmatpush3.bf16.msra.mxu0 %v1036_v9 }
 0x18a   :  { %966 = vmatprep.subr.bf16.mxu0 %v1239_v0 }
 0x18d   :  { %967 = vmatpush3.bf16.msra.mxu0 %v1037_v10 }
 0x18e   :  { %968 = vmatprep.subr.bf16.mxu0 %v1239_v0 }
 0x191   :  { %969 = vmatpush3.bf16.msra.mxu0 %v1038_v11 }
 0x247   :  { %v398_v50 = vpop.f32.mrb[4].mxu0 }
 0x248   :  { %v399_v51 = vadd.f32 %v815_v49, %v398_v50  ;;  %v932_v52 = vpop.f32.mrb[5].mxu0 }
 0x249   :  { %v401_v53 = vpop.f32.mrb[6].mxu0 }
 0x24a   :  { %v405_v54 = vmul.f32 %v399_v51, %v399_v51  ;;  %v933_v55 = vpop.f32.mrb[7].mxu0  ;;  %v404_v57 = vmul.f32 -1.5957692, %v399_v51 }
 0x24b   :  { %v842_v55 = vld [vmem:[%s1474_s10] ss:$0 sm:$0xff]  ;;  %s1199_s10 = scalar_lea.vmem %s791_s3, 128 }
 0x24c   :  { %v406_v56 = vmul.f32 0.044715, %v405_v54  ;;  %p1200_p6 = scmp.ne.s32.totalorder %s791_s3, %s1199_s10  ;;  %p1205_p8 = scmp.lt.s32.totalorder %s1199_s10, %s1199_s10 }
 0x24e   :  { %v407_v58 = vadd.f32 1.0, %v406_v56  ;;  %p1206_p9 = por %p1205_p8, %p1204_p7 }
 0x250   :  { %v408_v59 = vmul.f32 %v407_v58, %v404_v57  ;;  %p1207_p10 = pnand %p1206_p9, %p1200_p6 }
 0x252   :  { %v409_v60 = vmul.f32 1.442695, %v408_v59 }
 0x254   :  { %1051 = vpow2.f32 %v409_v60 }
 0x25e   :  { %v1052_v61 = vpop.eup %1051 }
 0x25f   :  { %v411_v62 = vadd.f32 1.0, %v1052_v61 }
 0x261   :  { %1053 = vrcp.f32 %v411_v62 }
 0x26b   :  { %v1054_v63 = vpop.eup %1053 }
 0x26c   :  { %v413_v1 = vmul.f32 %v1054_v63, %v399_v51 }
 0x26e   :  { %v414_v2 = vadd.f32 %v413_v1, %v291_v39 }
 0x270   :  { %v432_v3 = vpack.c.bf16 %v414_v2, %v414_v2 }
 0x272   :  { %951 = vmatmul.mubr.bf16.vlgmr.msra.gmra.mrb[4].mxu1 %v432_v3 }
 0x273   :  { %990 = vmatprep.mubr.msk.bf16.mxu1 %vm1240_vm0, %v1239_v0  ;;  %975 = vmatpush3.bf16.msra.mxu1 %v1039_v30 }
 0x274   :  { %976 = vmatprep.subr.bf16.mxu1 %v1239_v0 }
 0x277   :  { %977 = vmatpush3.bf16.msra.mxu1 %v1040_v31 }
 0x278   :  { %978 = vmatprep.subr.bf16.mxu1 %v1239_v0 }
 0x27b   :  { %979 = vmatpush3.bf16.msra.mxu1 %v1041_v32 }
 0x27c   :  { %980 = vmatprep.subr.bf16.mxu1 %v1239_v0 }
 0x27f   :  { %981 = vmatpush3.bf16.msra.mxu1 %v1042_v33 }
 0x280   :  { %982 = vmatprep.subr.bf16.mxu1 %v1239_v0 }
 0x283   :  { %983 = vmatpush3.bf16.msra.mxu1 %v1043_v34 }
 0x284   :  { %984 = vmatprep.subr.bf16.mxu1 %v1239_v0 }
 0x287   :  { %985 = vmatpush3.bf16.msra.mxu1 %v1044_v35 }
 0x288   :  { %986 = vmatprep.subr.bf16.mxu1 %v1239_v0 }
 0x28b   :  { %987 = vmatpush3.bf16.msra.mxu1 %v1045_v36 }
 0x28c   :  { %988 = vmatprep.subr.bf16.mxu1 %v1239_v0 }
 0x28f   :  { %989 = vmatpush3.bf16.msra.mxu1 %v1046_v37 }
 0x345   :  { %v521_v13 = vpop.f32.mrb[4].mxu1 }
 0x346   :  { %v522_v14 = vadd.f32 %v824_v12, %v521_v13  ;;  %v952_v15 = vpop.f32.mrb[5].mxu1 }
 0x347   :  { %v524_v16 = vpop.f32.mrb[6].mxu1 }
 0x348   :  { %v528_v17 = vmul.f32 %v522_v14, %v522_v14  ;;  %v953_v18 = vpop.f32.mrb[7].mxu1  ;;  %v527_v20 = vmul.f32 -1.5957692, %v522_v14 }
 0x34a   :  { %v529_v19 = vmul.f32 0.044715, %v528_v17 }
 0x34c   :  { %v530_v21 = vadd.f32 1.0, %v529_v19 }
 0x34e   :  { %v531_v22 = vmul.f32 %v530_v21, %v527_v20 }
 0x350   :  { %v532_v23 = vmul.f32 1.442695, %v531_v22 }
 0x352   :  { %1055 = vpow2.f32 %v532_v23 }
 0x35c   :  { %v1056_v24 = vpop.eup %1055 }
 0x35d   :  { %v534_v25 = vadd.f32 1.0, %v1056_v24 }
 0x35f   :  { %1057 = vrcp.f32 %v534_v25 }
 0x369   :  { %v1058_v26 = vpop.eup %1057 }
 0x36a   :  { %v536_v27 = vmul.f32 %v1058_v26, %v522_v14 }
 0x36c   :  { %v537_v28 = vadd.f32 %v536_v27, %v414_v2 }
 0x36e   :  { %v555_v29 = vpack.c.bf16 %v537_v28, %v537_v28 }
 0x370   :  { %971 = vmatmul.mubr.bf16.vlgmr.msra.gmra.mrb[8].mxu0 %v555_v29 }
 0x443   :  { %v644_v39 = vpop.f32.mrb[8].mxu0 }
 0x444   :  { %v645_v40 = vadd.f32 %v833_v38, %v644_v39  ;;  %v972_v41 = vpop.f32.mrb[9].mxu0 }
 0x445   :  { %v647_v42 = vpop.f32.mrb[10].mxu0 }
 0x446   :  { %v651_v43 = vmul.f32 %v645_v40, %v645_v40  ;;  %v973_v44 = vpop.f32.mrb[11].mxu0  ;;  %v650_v46 = vmul.f32 -1.5957692, %v645_v40 }
 0x448   :  { %v652_v45 = vmul.f32 0.044715, %v651_v43 }
 0x44a   :  { %v653_v47 = vadd.f32 1.0, %v652_v45 }
 0x44c   :  { %v654_v48 = vmul.f32 %v653_v47, %v650_v46 }
 0x44e   :  { %v655_v49 = vmul.f32 1.442695, %v654_v48 }
 0x450   :  { %1059 = vpow2.f32 %v655_v49 }
 0x45a   :  { %v1060_v50 = vpop.eup %1059 }
 0x45b   :  { %v657_v0 = vadd.f32 1.0, %v1060_v50 }
 0x45d   :  { %1061 = vrcp.f32 %v657_v0 }
 0x467   :  { %v1062_v51 = vpop.eup %1061 }
 0x468   :  { %v659_v52 = vmul.f32 %v1062_v51, %v645_v40 }
 0x46a   :  { %v660_v53 = vadd.f32 %v659_v52, %v537_v28 }
 0x46c   :  { %v678_v54 = vpack.c.bf16 %v660_v53, %v660_v53 }
 0x46e   :  { %991 = vmatmul.mubr.bf16.vlgmr.msra.gmra.mrb[8].mxu1 %v678_v54 }
 0x541   :  { %v767_v56 = vpop.f32.mrb[8].mxu1 }
 0x542   :  { %v768_v57 = vadd.f32 %v842_v55, %v767_v56  ;;  %v992_v58 = vpop.f32.mrb[9].mxu1 }
 0x543   :  { %v770_v59 = vpop.f32.mrb[10].mxu1 }
 0x544   :  { %v774_v60 = vmul.f32 %v768_v57, %v768_v57  ;;  %v993_v61 = vpop.f32.mrb[11].mxu1  ;;  %v773_v63 = vmul.f32 -1.5957692, %v768_v57 }
 0x546   :  { %v775_v62 = vmul.f32 0.044715, %v774_v60 }
 0x548   :  { %v776_v1 = vadd.f32 1.0, %v775_v62 }
 0x54a   :  { %v777_v2 = vmul.f32 %v776_v1, %v773_v63 }
 0x54c   :  { %v778_v3 = vmul.f32 1.442695, %v777_v2 }
 0x54e   :  { %1063 = vpow2.f32 %v778_v3 }
 0x558   :  { %v1064_v4 = vpop.eup %1063 }
 0x559   :  { %v780_v5 = vadd.f32 1.0, %v1064_v4 }
 0x55b   :  { %1065 = vrcp.f32 %v780_v5 }
 0x565   :  { %v1066_v6 = vpop.eup %1065 }
 0x566   :  { %v782_v7 = vmul.f32 %v1066_v6, %v768_v57 }
 0x568   :  { %783 = vst [vmem:[#allocation13] sm:$0xff] %v782_v7 }
 0x569   :  { %1210 = shalt.err (!%p1207_p10)
}
 0x56a   :  { %s1211_s21 = scalar_lea.hbm %s1475_s11, 128 }
 0x56b   :  { %p1212_p11 = scmp.ne.s32.totalorder %s1475_s11, %s1211_s21  ;;  %p1215_p12 = scmp.lt.u32.totalorder %s1211_s21, %s1475_s11 }
 0x56d   :  { %p1217_p13 = pnand %p1215_p12, %p1212_p11 }
 0x56f   :  { %1220 = shalt.err (!%p1217_p13)
}
 0x570   :  { %793 = dma.vmem_to_hbm [thread:$0]  %s791_s3, 128, %s1475_s11, [#allocation4]  }
 0x571   :  { %1229 = dma.done.wait [#allocation4], 128  }
 0x572   :  { %1230 = vsyncadd [#allocation4], 4294967168 }
 0x573   :  { %797 = vsyncpa [#allocation3], 1 }
 0x574   :  { %798 = vsyncpa [#allocation6], 1 }
 0x575   :  { %799 = vsyncpa [#allocation9], 1 }
 0x576   :  { %800 = vsyncpa [#allocation12], 1 }
 0x577   :  { %801 = vsyncpa [#allocation4], 1 }

// kernel: tpu_custom_call.1
= control target key start
LH: loop header
LB: loop body
LE: loop exit
PB: predicated region body
PF: predicated region fallthrough
CT: control target
= control target key end

     0   :  { %16 = vsyncpa [#allocation3], 0  ;;  %s1464_s0 = inlined_call_operand.hbm [shape: f32[8,32], index: 0, kind: input, shape index: {}]   ;;  %s1465_s1 = inlined_call_operand.hbm [shape: bf16[32,128], index: 1, kind: input, shape index: {}]   ;;  %s1466_s2 = inlined_call_operand.hbm [shape: bf16[128,128], index: 2, kind: input, shape index: {}]   ;;  %s1467_s3 = inlined_call_operand.hbm [shape: bf16[128,128], index: 3, kind: input, shape index: {}]   ;;  %s1468_s4 = inlined_call_operand.hbm [shape: bf16[128,128], index: 4, kind: input, shape index: {}]   ;;  %s1469_s5 = inlined_call_operand.hbm [shape: bf16[128,128], index: 5, kind: input, shape index: {}]   ;;  %s1470_s6 = inlined_call_operand.vmem [shape: f32[1,128], index: 6, kind: input, shape index: {}]   ;;  %s1471_s7 = inlined_call_operand.vmem [shape: f32[1,128], index: 7, kind: input, shape index: {}]   ;;  %s1472_s8 = inlined_call_operand.vmem [shape: f32[1,128], index: 8, kind: input, shape index: {}]   ;;  %s1473_s9 = inlined_call_operand.vmem [shape: f32[1,128], index: 9, kind: input, shape index: {}]   ;;  %s1474_s10 = inlined_call_operand.vmem [shape: f32[1,128], index: 10, kind: input, shape index: {}]   ;;  %s1475_s11 = inlined_call_operand.hbm [shape: f32[8,128], index: 11, kind: output, shape index: {}]  }
   0x1   :  { %17 = vsyncpa [#allocation6], 0 }
   0x2   :  { %18 = vsyncpa [#allocation9], 0 }
   0x3   :  { %19 = vsyncpa [#allocation12], 0 }
   0x4   :  { %20 = vsyncpa [#allocation4], 0  ;;  %s1231_s17 = smov [#allocation5]   ;;  %s1067_s21 = scalar_lea.hbm %s1465_s1, 256 }
   0x5   :  { %s36_s18 = sshll.u32 %s1231_s17, 4  ;;  %p1068_p0 = scmp.ne.s32.totalorder %s1465_s1, %s1067_s21  ;;  %s37_s18 = int_to_ptr.vmem [resolvable:$true] %s36_s18 }
   0x6   :  { %p1071_p1 = scmp.lt.u32.totalorder %s1067_s21, %s1465_s1 }
   0x8   :  { %p1073_p2 = pnand %p1071_p1, %p1068_p0 }
   0xa   :  { %1076 = shalt.err (!%p1073_p2)
}
   0xb   :  { %s1077_s26 = scalar_lea.vmem %s37_s18, 256  ;;  %p1082_p4 = scmp.lt.s32.totalorder %s37_s18, %s37_s18 }
   0xc   :  { %p1078_p3 = scmp.ne.s32.totalorder %s37_s18, %s1077_s26  ;;  %p1083_p5 = scmp.lt.s32.totalorder %s1077_s26, %s1077_s26 }
   0xe   :  { %p1084_p6 = por %p1083_p5, %p1082_p4 }
  0x10   :  { %p1085_p7 = pnand %p1084_p6, %p1078_p3 }
  0x12   :  { %1088 = shalt.err (!%p1085_p7)
}
  0x13   :  { %s1232_s27 = smov 64   ;;  %s1233_s28 = smov 4  }
  0x14   :  { %42 = dma.hbm_to_vmem [thread:$0]  %s1465_s1, 256, %s37_s18, [#allocation6], %s1232_s27, %s1232_s27, %s1233_s28  }
  0x15   :  { %s1234_s12 = smov [#allocation8]   ;;  %s1235_s14 = smov [#allocation2]  }
  0x16   :  { %s60_s13 = sshll.u32 %s1234_s12, 4  ;;  %s27_s15 = sshll.u32 %s1235_s14, 4  ;;  %s61_s13 = int_to_ptr.vmem [resolvable:$true] %s60_s13  ;;  %s28_s15 = int_to_ptr.vmem [resolvable:$true] %s27_s15 }
  0x17   :  { %s1089_s19 = scalar_lea.hbm %s1467_s3, 1024 }
  0x18   :  { %p1090_p8 = scmp.ne.s32.totalorder %s1467_s3, %s1089_s19  ;;  %p1093_p9 = scmp.lt.u32.totalorder %s1089_s19, %s1467_s3 }
  0x1a   :  { %p1095_p10 = pnand %p1093_p9, %p1090_p8 }
  0x1c   :  { %1098 = shalt.err (!%p1095_p10)
}
  0x1d   :  { %s1099_s1 = scalar_lea.vmem %s61_s13, 1024  ;;  %p1104_p12 = scmp.lt.s32.totalorder %s61_s13, %s61_s13 }
  0x1e   :  { %p1100_p11 = scmp.ne.s32.totalorder %s61_s13, %s1099_s1  ;;  %p1105_p13 = scmp.lt.s32.totalorder %s1099_s1, %s1099_s1 }
  0x20   :  { %p1106_p0 = por %p1105_p13, %p1104_p12 }
  0x22   :  { %p1107_p1 = pnand %p1106_p0, %p1100_p11 }
  0x24   :  { %1110 = shalt.err (!%p1107_p1)
}
  0x25   :  { %66 = dma.hbm_to_vmem [thread:$0]  %s1467_s3, 1024, %s61_s13, [#allocation9], %s1232_s27, %s1232_s27, %s1233_s28  }
  0x26   :  { %s1111_s29 = scalar_lea.hbm %s1464_s0, 128 }
  0x27   :  { %p1112_p2 = scmp.ne.s32.totalorder %s1464_s0, %s1111_s29  ;;  %p1115_p3 = scmp.lt.u32.totalorder %s1111_s29, %s1464_s0 }
  0x29   :  { %p1117_p4 = pnand %p1115_p3, %p1112_p2 }
  0x2b   :  { %1120 = shalt.err (!%p1117_p4)
}
  0x2c   :  { %s1121_s17 = scalar_lea.vmem %s28_s15, 128  ;;  %p1126_p6 = scmp.lt.s32.totalorder %s28_s15, %s28_s15 }
  0x2d   :  { %p1122_p5 = scmp.ne.s32.totalorder %s28_s15, %s1121_s17  ;;  %p1127_p7 = scmp.lt.s32.totalorder %s1121_s17, %s1121_s17 }
  0x2f   :  { %p1128_p8 = por %p1127_p7, %p1126_p6 }
  0x31   :  { %p1129_p9 = pnand %p1128_p8, %p1122_p5 }
  0x33   :  { %1132 = shalt.err (!%p1129_p9)
}
  0x34   :  { %30 = dma.hbm_to_vmem [thread:$0]  %s1464_s0, 128, %s28_s15, [#allocation3]  }
  0x35   :  { %s1236_s19 = smov [#allocation7]   ;;  %s1237_s21 = smov [#allocation10]  }
  0x36   :  { %s48_s20 = sshll.u32 %s1236_s19, 4  ;;  %s72_s22 = sshll.u32 %s1237_s21, 4  ;;  %s49_s20 = int_to_ptr.vmem [resolvable:$true] %s48_s20  ;;  %s73_s22 = int_to_ptr.vmem [resolvable:$true] %s72_s22 }
  0x37   :  { %s1133_s18 = scalar_lea.hbm %s1466_s2, 1024 }
  0x38   :  { %p1134_p10 = scmp.ne.s32.totalorder %s1466_s2, %s1133_s18  ;;  %p1137_p11 = scmp.lt.u32.totalorder %s1133_s18, %s1466_s2 }
  0x3a   :  { %p1139_p12 = pnand %p1137_p11, %p1134_p10 }
  0x3c   :  { %1142 = shalt.err (!%p1139_p12)
}
  0x3d   :  { %s1143_s0 = scalar_lea.vmem %s49_s20, 1024  ;;  %p1148_p0 = scmp.lt.s32.totalorder %s49_s20, %s49_s20 }
  0x3e   :  { %p1144_p13 = scmp.ne.s32.totalorder %s49_s20, %s1143_s0  ;;  %p1149_p1 = scmp.lt.s32.totalorder %s1143_s0, %s1143_s0 }
  0x40   :  { %p1150_p2 = por %p1149_p1, %p1148_p0 }
  0x42   :  { %p1151_p3 = pnand %p1150_p2, %p1144_p13 }
  0x44   :  { %1154 = shalt.err (!%p1151_p3)
}
  0x45   :  { %54 = dma.hbm_to_vmem [thread:$0]  %s1466_s2, 1024, %s49_s20, [#allocation6], %s1232_s27, %s1232_s27, %s1233_s28  }
  0x46   :  { %s1155_s16 = scalar_lea.hbm %s1468_s4, 1024 }
  0x47   :  { %p1156_p4 = scmp.ne.s32.totalorder %s1468_s4, %s1155_s16  ;;  %p1159_p5 = scmp.lt.u32.totalorder %s1155_s16, %s1468_s4 }
  0x49   :  { %p1161_p6 = pnand %p1159_p5, %p1156_p4 }
  0x4b   :  { %1164 = shalt.err (!%p1161_p6)
}
  0x4c   :  { %s1165_s21 = scalar_lea.vmem %s73_s22, 1024  ;;  %p1170_p8 = scmp.lt.s32.totalorder %s73_s22, %s73_s22 }
  0x4d   :  { %p1166_p7 = scmp.ne.s32.totalorder %s73_s22, %s1165_s21  ;;  %p1171_p9 = scmp.lt.s32.totalorder %s1165_s21, %s1165_s21 }
  0x4f   :  { %p1172_p10 = por %p1171_p9, %p1170_p8 }
  0x51   :  { %p1173_p11 = pnand %p1172_p10, %p1166_p7 }
  0x53   :  { %1176 = shalt.err (!%p1173_p11)
}
  0x54   :  { %78 = dma.hbm_to_vmem [thread:$0]  %s1468_s4, 1024, %s73_s22, [#allocation9], %s1232_s27, %s1232_s27, %s1233_s28  }
  0x55   :  { %s1238_s23 = smov [#allocation11]   ;;  %s1177_s25 = scalar_lea.hbm %s1469_s5, 1024 }
  0x56   :  { %s84_s1 = sshll.u32 %s1238_s23, 4  ;;  %p1178_p12 = scmp.ne.s32.totalorder %s1469_s5, %s1177_s25  ;;  %s85_s1 = int_to_ptr.vmem [resolvable:$true] %s84_s1 }
  0x57   :  { %p1181_p13 = scmp.lt.u32.totalorder %s1177_s25, %s1469_s5 }
  0x59   :  { %p1183_p0 = pnand %p1181_p13, %p1178_p12 }
  0x5b   :  { %1186 = shalt.err (!%p1183_p0)
}
  0x5c   :  { %s1187_s30 = scalar_lea.vmem %s85_s1, 1024  ;;  %p1192_p2 = scmp.lt.s32.totalorder %s85_s1, %s85_s1 }
  0x5d   :  { %p1188_p1 = scmp.ne.s32.totalorder %s85_s1, %s1187_s30  ;;  %p1193_p3 = scmp.lt.s32.totalorder %s1187_s30, %s1187_s30 }
  0x5f   :  { %p1194_p4 = por %p1193_p3, %p1192_p2 }
  0x61   :  { %p1195_p5 = pnand %p1194_p4, %p1188_p1 }
  0x63   :  { %1198 = shalt.err (!%p1195_p5)
}
  0x64   :  { %90 = dma.hbm_to_vmem [thread:$0]  %s1469_s5, 1024, %s85_s1, [#allocation12], %s1232_s27, %s1232_s27, %s1233_s28  }
  0x65   :  { %1221 = dma.done.wait [#allocation3], 128  }
  0x66   :  { %1222 = vsyncadd [#allocation3], 4294967168 }
  0x67   :  { %1223 = dma.done.wait [#allocation6], 1280  }
  0x68   :  { %1224 = vsyncadd [#allocation6], 4294966016 }
  0x69   :  { %1225 = dma.done.wait [#allocation9], 2048  }
  0x6a   :  { %1226 = vsyncadd [#allocation9], 4294965248 }
  0x6b   :  { %1227 = dma.done.wait [#allocation12], 1024  }
  0x6c   :  { %1228 = vsyncadd [#allocation12], 4294966272  ;;  %v1239_v0 = vmov 0.0   ;;  %vm1240_vm0 = vmmov 0   ;;  %v199_v1 = vlaneseq  ;;  %v1241_v2 = vmov 0.0|0.0   ;;  %v1013_v8 = vld [vmem:[#allocation5] sm:$0xff]  }
  0x6d   :  { %895 = vmatprep.subr.bf16.mxu0 %v1239_v0  ;;  %899 = vmatprep.mubr.msk.bf16.mxu0 %vm1240_vm0, %v1239_v0  ;;  %v1014_v9 = vld [vmem:[#allocation5 + $0x8] sm:$0xff]   ;;  %v120_v10 = vld [vmem:[#allocation2] sm:$0xff]  ;;  %vm145_vm6 = vcmask 261120   ;;  %v1242_v11 = vmov 1.0|1.0   ;;  %v1015_v13 = vld [vmem:[#allocation7] sm:$0xff]  }
  0x6e   :  { %994 = vmatprep.subr.bf16.mxu1 %v1241_v2  ;;  %911 = vmatprep.mubr.msk.f32.mxu1 %vm1240_vm0, %v1239_v0  ;;  %v200_v3 = vshrl.u32 %v199_v1, 7  ;;  %v205_v4 = vand.u32 127, %v199_v1  ;;  %v126_v12 = vpack.c.bf16 %v120_v10, %v120_v10  ;;  %v1016_v14 = vld [vmem:[#allocation7 + $0x8] sm:$0xff]   ;;  %v1017_v15 = vld [vmem:[#allocation7 + $0x10] sm:$0xff]   ;;  %v1018_v16 = vld [vmem:[#allocation7 + $0x18] sm:$0xff]   ;;  %s1243_s17 = smov [#allocation13]  }
  0x6f   :  { %896 = vmatpush3.bf16.msra.mxu0 %v1013_v8  ;;  %v1019_v17 = vld [vmem:[#allocation7 + $0x20] sm:$0xff]   ;;  %v1020_v18 = vld [vmem:[#allocation7 + $0x28] sm:$0xff]   ;;  %v1021_v19 = vld [vmem:[#allocation7 + $0x30] sm:$0xff]   ;;  %s790_s3 = sshll.u32 %s1243_s17, 4  ;;  %s791_s3 = int_to_ptr.vmem [resolvable:$true] %s790_s3 }
  0x70   :  { %v201_v5 = vadd.s32 8, %v200_v3  ;;  %v202_v6 = vadd.s32 16, %v200_v3  ;;  %v203_v7 = vadd.s32 24, %v200_v3  ;;  %vm206_vm1 = vcmp.eq.s32.totalorder %v200_v3, %v205_v4  ;;  %897 = vmatprep.subr.bf16.mxu0 %v1239_v0  ;;  %v1022_v20 = vld [vmem:[#allocation7 + $0x38] sm:$0xff]   ;;  %v802_v21 = vld [vmem:[%s1470_s6] ss:$0 sm:$0xff]  ;;  %p1204_p7 = scmp.lt.s32.totalorder %s791_s3, %s791_s3 }
  0x71   :  { %v1023_v41 = vld [vmem:[#allocation8] sm:$0xff]   ;;  %v1024_v42 = vld [vmem:[#allocation8 + $0x8] sm:$0xff]   ;;  %v1025_v43 = vld [vmem:[#allocation8 + $0x10] sm:$0xff]  }
  0x72   :  { %vm207_vm2 = vcmp.eq.s32.totalorder %v201_v5, %v205_v4  ;;  %vm208_vm3 = vcmp.eq.s32.totalorder %v202_v6, %v205_v4  ;;  %vm209_vm4 = vcmp.eq.s32.totalorder %v203_v7, %v205_v4  ;;  %v1026_v44 = vld [vmem:[#allocation8 + $0x18] sm:$0xff]   ;;  %v1027_v45 = vld [vmem:[#allocation8 + $0x20] sm:$0xff]   ;;  %v1028_v46 = vld [vmem:[#allocation8 + $0x28] sm:$0xff]  }
  0x73   :  { %vm995_vm5 = vmpackc.low %vm207_vm2, %vm206_vm1  ;;  %898 = vmatpush3.bf16.msra.mxu0 %v1014_v9  ;;  %v1029_v47 = vld [vmem:[#allocation8 + $0x30] sm:$0xff]   ;;  %v1030_v48 = vld [vmem:[#allocation8 + $0x38] sm:$0xff]  }
  0x74   :  { %996 = vmatpush3.bf16.msk.msra.mxu1 %vm995_vm5, %v1242_v11  ;;  %vm998_vm7 = vmpackc.low %vm209_vm4, %vm208_vm3  ;;  %914 = vmatprep.subr.bf16.mxu0 %v1239_v0  ;;  %v815_v49 = vld [vmem:[%s1471_s7] ss:$0 sm:$0xff]  ;;  %v1031_v4 = vld [vmem:[#allocation10] sm:$0xff]  }
  0x75   :  { %997 = vmatprep.subr.bf16.mxu1 %v1241_v2  ;;  %v1032_v5 = vld [vmem:[#allocation10 + $0x8] sm:$0xff]   ;;  %v1033_v6 = vld [vmem:[#allocation10 + $0x10] sm:$0xff]   ;;  %v1034_v7 = vld [vmem:[#allocation10 + $0x18] sm:$0xff]  }
  0x76   :  { %900 = vmatmul.mubr.msk.bf16.vlgmr.msra.gmra.mrb[0].mxu0 %vm145_vm6, %v126_v12  ;;  %v1035_v8 = vld [vmem:[#allocation10 + $0x20] sm:$0xff]   ;;  %v1036_v9 = vld [vmem:[#allocation10 + $0x28] sm:$0xff]  }
  0x77   :  { %930 = vmatprep.mubr.msk.bf16.mxu0 %vm1240_vm0, %v1239_v0  ;;  %915 = vmatpush3.bf16.msra.mxu0 %v1015_v13  ;;  %v824_v12 = vld [vmem:[%s1472_s8] ss:$0 sm:$0xff] }
  0x78   :  { %999 = vmatpush3.bf16.msk.msra.mxu1 %vm998_vm7, %v1242_v11  ;;  %916 = vmatprep.subr.bf16.mxu0 %v1239_v0  ;;  %v1038_v11 = vld [vmem:[#allocation10 + $0x38] sm:$0xff]  }
  0x79   :  { %934 = vmatprep.subr.bf16.mxu1 %v1239_v0 }
  0x7b   :  { %912 = vmatmul.mubr.msk.f32.vlgmr.msra.gmra.mrb[0].mxu1 %vm145_vm6, %v120_v10  ;;  %917 = vmatpush3.bf16.msra.mxu0 %v1016_v14  ;;  %v1037_v10 = vld [vmem:[#allocation10 + $0x30] sm:$0xff]  }
  0x7c   :  { %950 = vmatprep.mubr.msk.bf16.mxu1 %vm1240_vm0, %v1239_v0  ;;  %918 = vmatprep.subr.bf16.mxu0 %v1239_v0 }
  0x7d   :  { %935 = vmatpush3.bf16.msra.mxu1 %v1023_v41 }
  0x7e   :  { %936 = vmatprep.subr.bf16.mxu1 %v1239_v0 }
  0x7f   :  { %919 = vmatpush3.bf16.msra.mxu0 %v1017_v15 }
  0x80   :  { %920 = vmatprep.subr.bf16.mxu0 %v1239_v0 }
  0x81   :  { %937 = vmatpush3.bf16.msra.mxu1 %v1024_v42 }
  0x82   :  { %938 = vmatprep.subr.bf16.mxu1 %v1239_v0 }
  0x83   :  { %921 = vmatpush3.bf16.msra.mxu0 %v1018_v16 }
  0x84   :  { %922 = vmatprep.subr.bf16.mxu0 %v1239_v0 }
  0x85   :  { %939 = vmatpush3.bf16.msra.mxu1 %v1025_v43 }
  0x86   :  { %940 = vmatprep.subr.bf16.mxu1 %v1239_v0 }
  0x87   :  { %923 = vmatpush3.bf16.msra.mxu0 %v1019_v17 }
  0x88   :  { %924 = vmatprep.subr.bf16.mxu0 %v1239_v0 }
  0x89   :  { %941 = vmatpush3.bf16.msra.mxu1 %v1026_v44 }
  0x8a   :  { %942 = vmatprep.subr.bf16.mxu1 %v1239_v0 }
  0x8b   :  { %925 = vmatpush3.bf16.msra.mxu0 %v1020_v18 }
  0x8c   :  { %926 = vmatprep.subr.bf16.mxu0 %v1239_v0 }
  0x8d   :  { %943 = vmatpush3.bf16.msra.mxu1 %v1027_v45 }
  0x8e   :  { %944 = vmatprep.subr.bf16.mxu1 %v1239_v0 }
  0x8f   :  { %927 = vmatpush3.bf16.msra.mxu0 %v1021_v19 }
  0x90   :  { %928 = vmatprep.subr.bf16.mxu0 %v1239_v0 }
  0x91   :  { %945 = vmatpush3.bf16.msra.mxu1 %v1028_v46 }
  0x92   :  { %946 = vmatprep.subr.bf16.mxu1 %v1239_v0 }
  0x93   :  { %929 = vmatpush3.bf16.msra.mxu0 %v1022_v20 }
  0x94   :  { %954 = vmatprep.subr.bf16.mxu0 %v1239_v0 }
  0x95   :  { %947 = vmatpush3.bf16.msra.mxu1 %v1029_v47 }
  0x96   :  { %948 = vmatprep.subr.bf16.mxu1 %v1239_v0 }
  0x99   :  { %949 = vmatpush3.bf16.msra.mxu1 %v1030_v48 }
  0x9a   :  { %974 = vmatprep.subr.bf16.mxu1 %v1239_v0 }
 0x149   :  { %v183_v22 = vpop.f32.mrb[0].mxu0 }
 0x14a   :  { %v184_v23 = vadd.f32 %v802_v21, %v183_v22  ;;  %v901_v24 = vpop.f32.mrb[1].mxu0 }
 0x14b   :  { %v186_v26 = vpop.f32.mrb[2].mxu0 }
 0x14c   :  { %v190_v28 = vmul.f32 %v184_v23, %v184_v23  ;;  %v902_v29 = vpop.f32.mrb[3].mxu0  ;;  %v189_v31 = vmul.f32 -1.5957692, %v184_v23 }
 0x14e   :  { %v287_v25 = vpop.f32.mrb[0].mxu1  ;;  %v191_v30 = vmul.f32 0.044715, %v190_v28 }
 0x14f   :  { %v913_v27 = vpop.f32.mrb[1].mxu1 }
 0x150   :  { %v192_v32 = vadd.f32 1.0, %v191_v30  ;;  %v1039_v30 = vld [vmem:[#allocation11] sm:$0xff]  }
 0x152   :  { %v193_v33 = vmul.f32 %v192_v32, %v189_v31  ;;  %v1040_v31 = vld [vmem:[#allocation11 + $0x8] sm:$0xff]   ;;  %v1041_v32 = vld [vmem:[#allocation11 + $0x10] sm:$0xff]  }
 0x154   :  { %v194_v34 = vmul.f32 1.442695, %v193_v33  ;;  %v1042_v33 = vld [vmem:[#allocation11 + $0x18] sm:$0xff]  }
 0x156   :  { %1047 = vpow2.f32 %v194_v34  ;;  %v1043_v34 = vld [vmem:[#allocation11 + $0x20] sm:$0xff]  }
 0x160   :  { %v1048_v35 = vpop.eup %1047 }
 0x161   :  { %v196_v36 = vadd.f32 1.0, %v1048_v35  ;;  %v1044_v35 = vld [vmem:[#allocation11 + $0x28] sm:$0xff]  }
 0x163   :  { %1049 = vrcp.f32 %v196_v36  ;;  %v1045_v36 = vld [vmem:[#allocation11 + $0x30] sm:$0xff]  }
 0x16d   :  { %v1050_v37 = vpop.eup %1049 }
 0x16e   :  { %v198_v38 = vmul.f32 %v1050_v37, %v184_v23  ;;  %v1046_v37 = vld [vmem:[#allocation11 + $0x38] sm:$0xff]  }
 0x170   :  { %v291_v39 = vadd.f32 %v287_v25, %v198_v38  ;;  %v833_v38 = vld [vmem:[%s1473_s9] ss:$0 sm:$0xff] }
 0x172   :  { %v309_v40 = vpack.c.bf16 %v291_v39, %v291_v39 }
 0x174   :  { %931 = vmatmul.mubr.bf16.vlgmr.msra.gmra.mrb[4].mxu0 %v309_v40 }
 0x175   :  { %970 = vmatprep.mubr.msk.bf16.mxu0 %vm1240_vm0, %v1239_v0  ;;  %955 = vmatpush3.bf16.msra.mxu0 %v1031_v4 }
 0x176   :  { %956 = vmatprep.subr.bf16.mxu0 %v1239_v0 }
 0x179   :  { %957 = vmatpush3.bf16.msra.mxu0 %v1032_v5 }
 0x17a   :  { %958 = vmatprep.subr.bf16.mxu0 %v1239_v0 }
 0x17d   :  { %959 = vmatpush3.bf16.msra.mxu0 %v1033_v6 }
 0x17e   :  { %960 = vmatprep.subr.bf16.mxu0 %v1239_v0 }
 0x181   :  { %961 = vmatpush3.bf16.msra.mxu0 %v1034_v7 }
 0x182   :  { %962 = vmatprep.subr.bf16.mxu0 %v1239_v0 }
 0x185   :  { %963 = vmatpush3.bf16.msra.mxu0 %v1035_v8 }
 0x186   :  { %964 = vmatprep.subr.bf16.mxu0 %v1239_v0 }
 0x189   :  { %965 = vmatpush3.bf16.msra.mxu0 %v1036_v9 }
 0x18a   :  { %966 = vmatprep.subr.bf16.mxu0 %v1239_v0 }
 0x18d   :  { %967 = vmatpush3.bf16.msra.mxu0 %v1037_v10 }
 0x18e   :  { %968 = vmatprep.subr.bf16.mxu0 %v1239_v0 }
 0x191   :  { %969 = vmatpush3.bf16.msra.mxu0 %v1038_v11 }
 0x247   :  { %v398_v50 = vpop.f32.mrb[4].mxu0 }
 0x248   :  { %v399_v51 = vadd.f32 %v815_v49, %v398_v50  ;;  %v932_v52 = vpop.f32.mrb[5].mxu0 }
 0x249   :  { %v401_v53 = vpop.f32.mrb[6].mxu0 }
 0x24a   :  { %v405_v54 = vmul.f32 %v399_v51, %v399_v51  ;;  %v933_v55 = vpop.f32.mrb[7].mxu0  ;;  %v404_v57 = vmul.f32 -1.5957692, %v399_v51 }
 0x24b   :  { %v842_v55 = vld [vmem:[%s1474_s10] ss:$0 sm:$0xff]  ;;  %s1199_s10 = scalar_lea.vmem %s791_s3, 128 }
 0x24c   :  { %v406_v56 = vmul.f32 0.044715, %v405_v54  ;;  %p1200_p6 = scmp.ne.s32.totalorder %s791_s3, %s1199_s10  ;;  %p1205_p8 = scmp.lt.s32.totalorder %s1199_s10, %s1199_s10 }
 0x24e   :  { %v407_v58 = vadd.f32 1.0, %v406_v56  ;;  %p1206_p9 = por %p1205_p8, %p1204_p7 }
 0x250   :  { %v408_v59 = vmul.f32 %v407_v58, %v404_v57  ;;  %p1207_p10 = pnand %p1206_p9, %p1200_p6 }
 0x252   :  { %v409_v60 = vmul.f32 1.442695, %v408_v59 }
 0x254   :  { %1051 = vpow2.f32 %v409_v60 }
 0x25e   :  { %v1052_v61 = vpop.eup %1051 }
 0x25f   :  { %v411_v62 = vadd.f32 1.0, %v1052_v61 }
 0x261   :  { %1053 = vrcp.f32 %v411_v62 }
 0x26b   :  { %v1054_v63 = vpop.eup %1053 }
 0x26c   :  { %v413_v1 = vmul.f32 %v1054_v63, %v399_v51 }
 0x26e   :  { %v414_v2 = vadd.f32 %v413_v1, %v291_v39 }
 0x270   :  { %v432_v3 = vpack.c.bf16 %v414_v2, %v414_v2 }
 0x272   :  { %951 = vmatmul.mubr.bf16.vlgmr.msra.gmra.mrb[4].mxu1 %v432_v3 }
 0x273   :  { %990 = vmatprep.mubr.msk.bf16.mxu1 %vm1240_vm0, %v1239_v0  ;;  %975 = vmatpush3.bf16.msra.mxu1 %v1039_v30 }
 0x274   :  { %976 = vmatprep.subr.bf16.mxu1 %v1239_v0 }
 0x277   :  { %977 = vmatpush3.bf16.msra.mxu1 %v1040_v31 }
 0x278   :  { %978 = vmatprep.subr.bf16.mxu1 %v1239_v0 }
 0x27b   :  { %979 = vmatpush3.bf16.msra.mxu1 %v1041_v32 }
 0x27c   :  { %980 = vmatprep.subr.bf16.mxu1 %v1239_v0 }
 0x27f   :  { %981 = vmatpush3.bf16.msra.mxu1 %v1042_v33 }
 0x280   :  { %982 = vmatprep.subr.bf16.mxu1 %v1239_v0 }
 0x283   :  { %983 = vmatpush3.bf16.msra.mxu1 %v1043_v34 }
 0x284   :  { %984 = vmatprep.subr.bf16.mxu1 %v1239_v0 }
 0x287   :  { %985 = vmatpush3.bf16.msra.mxu1 %v1044_v35 }
 0x288   :  { %986 = vmatprep.subr.bf16.mxu1 %v1239_v0 }
 0x28b   :  { %987 = vmatpush3.bf16.msra.mxu1 %v1045_v36 }
 0x28c   :  { %988 = vmatprep.subr.bf16.mxu1 %v1239_v0 }
 0x28f   :  { %989 = vmatpush3.bf16.msra.mxu1 %v1046_v37 }
 0x345   :  { %v521_v13 = vpop.f32.mrb[4].mxu1 }
 0x346   :  { %v522_v14 = vadd.f32 %v824_v12, %v521_v13  ;;  %v952_v15 = vpop.f32.mrb[5].mxu1 }
 0x347   :  { %v524_v16 = vpop.f32.mrb[6].mxu1 }
 0x348   :  { %v528_v17 = vmul.f32 %v522_v14, %v522_v14  ;;  %v953_v18 = vpop.f32.mrb[7].mxu1  ;;  %v527_v20 = vmul.f32 -1.5957692, %v522_v14 }
 0x34a   :  { %v529_v19 = vmul.f32 0.044715, %v528_v17 }
 0x34c   :  { %v530_v21 = vadd.f32 1.0, %v529_v19 }
 0x34e   :  { %v531_v22 = vmul.f32 %v530_v21, %v527_v20 }
 0x350   :  { %v532_v23 = vmul.f32 1.442695, %v531_v22 }
 0x352   :  { %1055 = vpow2.f32 %v532_v23 }
 0x35c   :  { %v1056_v24 = vpop.eup %1055 }
 0x35d   :  { %v534_v25 = vadd.f32 1.0, %v1056_v24 }
 0x35f   :  { %1057 = vrcp.f32 %v534_v25 }
 0x369   :  { %v1058_v26 = vpop.eup %1057 }
 0x36a   :  { %v536_v27 = vmul.f32 %v1058_v26, %v522_v14 }
 0x36c   :  { %v537_v28 = vadd.f32 %v536_v27, %v414_v2 }
 0x36e   :  { %v555_v29 = vpack.c.bf16 %v537_v28, %v537_v28 }
 0x370   :  { %971 = vmatmul.mubr.bf16.vlgmr.msra.gmra.mrb[8].mxu0 %v555_v29 }
 0x443   :  { %v644_v39 = vpop.f32.mrb[8].mxu0 }
 0x444   :  { %v645_v40 = vadd.f32 %v833_v38, %v644_v39  ;;  %v972_v41 = vpop.f32.mrb[9].mxu0 }
 0x445   :  { %v647_v42 = vpop.f32.mrb[10].mxu0 }
 0x446   :  { %v651_v43 = vmul.f32 %v645_v40, %v645_v40  ;;  %v973_v44 = vpop.f32.mrb[11].mxu0  ;;  %v650_v46 = vmul.f32 -1.5957692, %v645_v40 }
 0x448   :  { %v652_v45 = vmul.f32 0.044715, %v651_v43 }
 0x44a   :  { %v653_v47 = vadd.f32 1.0, %v652_v45 }
 0x44c   :  { %v654_v48 = vmul.f32 %v653_v47, %v650_v46 }
 0x44e   :  { %v655_v49 = vmul.f32 1.442695, %v654_v48 }
 0x450   :  { %1059 = vpow2.f32 %v655_v49 }
 0x45a   :  { %v1060_v50 = vpop.eup %1059 }
 0x45b   :  { %v657_v0 = vadd.f32 1.0, %v1060_v50 }
 0x45d   :  { %1061 = vrcp.f32 %v657_v0 }
 0x467   :  { %v1062_v51 = vpop.eup %1061 }
 0x468   :  { %v659_v52 = vmul.f32 %v1062_v51, %v645_v40 }
 0x46a   :  { %v660_v53 = vadd.f32 %v659_v52, %v537_v28 }
 0x46c   :  { %v678_v54 = vpack.c.bf16 %v660_v53, %v660_v53 }
 0x46e   :  { %991 = vmatmul.mubr.bf16.vlgmr.msra.gmra.mrb[8].mxu1 %v678_v54 }
 0x541   :  { %v767_v56 = vpop.f32.mrb[8].mxu1 }
 0x542   :  { %v768_v57 = vadd.f32 %v842_v55, %v767_v56  ;;  %v992_v58 = vpop.f32.mrb[9].mxu1 }
 0x543   :  { %v770_v59 = vpop.f32.mrb[10].mxu1 }
 0x544   :  { %v774_v60 = vmul.f32 %v768_v57, %v768_v57  ;;  %v993_v61 = vpop.f32.mrb[11].mxu1  ;;  %v773_v63 = vmul.f32 -1.5957692, %v768_v57 }
 0x546   :  { %v775_v62 = vmul.f32 0.044715, %v774_v60 }
 0x548   :  { %v776_v1 = vadd.f32 1.0, %v775_v62 }
 0x54a   :  { %v777_v2 = vmul.f32 %v776_v1, %v773_v63 }
 0x54c   :  { %v778_v3 = vmul.f32 1.442695, %v777_v2 }
 0x54e   :  { %1063 = vpow2.f32 %v778_v3 }
 0x558   :  { %v1064_v4 = vpop.eup %1063 }
 0x559   :  { %v780_v5 = vadd.f32 1.0, %v1064_v4 }
 0x55b   :  { %1065 = vrcp.f32 %v780_v5 }
 0x565   :  { %v1066_v6 = vpop.eup %1065 }
 0x566   :  { %v782_v7 = vmul.f32 %v1066_v6, %v768_v57 }
 0x568   :  { %783 = vst [vmem:[#allocation13] sm:$0xff] %v782_v7 }
 0x569   :  { %1210 = shalt.err (!%p1207_p10)
}
 0x56a   :  { %s1211_s21 = scalar_lea.hbm %s1475_s11, 128 }
 0x56b   :  { %p1212_p11 = scmp.ne.s32.totalorder %s1475_s11, %s1211_s21  ;;  %p1215_p12 = scmp.lt.u32.totalorder %s1211_s21, %s1475_s11 }
 0x56d   :  { %p1217_p13 = pnand %p1215_p12, %p1212_p11 }
 0x56f   :  { %1220 = shalt.err (!%p1217_p13)
}
 0x570   :  { %793 = dma.vmem_to_hbm [thread:$0]  %s791_s3, 128, %s1475_s11, [#allocation4]  }
 0x571   :  { %1229 = dma.done.wait [#allocation4], 128  }
 0x572   :  { %1230 = vsyncadd [#allocation4], 4294967168 }
 0x573   :  { %797 = vsyncpa [#allocation3], 1 }
 0x574   :  { %798 = vsyncpa [#allocation6], 1 }
 0x575   :  { %799 = vsyncpa [#allocation9], 1 }
 0x576   :  { %800 = vsyncpa [#allocation12], 1 }
 0x577   :  { %801 = vsyncpa [#allocation4], 1 }

</bundles_post_ra>
